<compile_context>
chip_gen: v6e
topology: v6e:2x2x1
jax: 0.10.0
libtpu: 0.0.40
codegen_flags: <defaults>
</compile_context>

<pallas_src>
import jax
import jax.numpy as jnp
from jax.experimental import pallas as pl
from jax.experimental.pallas import tpu as pltpu

EPS = 1e-5                      # nn.BatchNorm2d default
LANE = 128                      # lane width -> output-channel padding
SUBLANE = 8
VMEM_LIMIT = 32 * 1024 * 1024   # safe budget on v5e/v6e (128 MiB) and v7x (64 MiB)


def _round_up(x, m):
    return (x + m - 1) // m * m


def _pick_tile(m, target=1024):
    """Largest divisor of m that is a multiple of 8 and <= target (fallback m)."""
    for t in range(min(m, target), 0, -1):
        if m % t == 0 and t % SUBLANE == 0:
            return t
    return m


# ----------------------------------------------------------------------------
# Kernel 1: conv (in-kernel im2col, bf16 MXU, f32 acc) + per-tile BN partials.
# ----------------------------------------------------------------------------
def _make_conv_kernel(k, stride, w_out):
    def kernel(*refs):
        x_refs = refs[:k]                    # k row bands: (1,1,stride,Wq,Cin_pad) bf16
        w_ref = refs[k]                      # (k, k, Cin_pad, Cout_pad) bf16
        y_ref, st_ref = refs[k + 1], refs[k + 2]

        acc = None
        for i in range(k):                   # kernel row tap
            for j in range(k):               # kernel col tap
                q, r = j // stride, j % stride
                patch = x_refs[i][0, 0, r, q:q + w_out, :]          # (Wo, Cin_pad)
                part = jnp.dot(patch, w_ref[i, j],
                               preferred_element_type=jnp.float32)  # MXU, f32 acc
                acc = part if acc is None else acc + part

        y_ref[0, 0] = acc                                           # (Wo, Cout_pad) f32
        # per-(n, ho) BatchNorm partial stats; reduced outside the kernel so
        # both grid axes stay "parallel".
        st_ref[0, 0, 0:1, :] = jnp.sum(acc, axis=0, keepdims=True)
        st_ref[0, 0, 1:2, :] = jnp.sum(acc * acc, axis=0, keepdims=True)

    return kernel


def conv2d_bn_stats(x_nhwc, w_hwio, kernel_size, stride, padding):
    """Conv2d (no bias) + per-tile BN partial sums.

    x_nhwc: (N, H, W, Cin); w_hwio: (k, k, Cin_pad, Cout_pad) zero-padded HWIO
    weights (Cout_pad a multiple of 128).  Returns
      y:     (N, Ho, Wo, Cout_pad) f32   pre-BN conv output
      stats: (N, Ho, 2, Cout_pad)  f32   per-row-tile [sum, sum_of_squares]
    """
    n, h, w, cin = x_nhwc.shape
    k = kernel_size
    kh, kw, cin_pad, cout_pad = w_hwio.shape
    assert kh == k and kw == k and cin_pad >= cin and cout_pad % LANE == 0

    ho = (h + 2 * padding - k) // stride + 1
    wo = (w + 2 * padding - k) // stride + 1
    hp = h + 2 * padding
    wq = -(-(w + 2 * padding) // stride)      # ceil
    wp_full = wq * stride

    # Pad (spatial + channels), factor W into (Wq, stride) and move the stride
    # remainder axis in front of Wq so every kernel tap becomes a contiguous
    # (Wo, Cin_pad) slice inside the kernel (no strided in-kernel loads).
    xp = jnp.pad(x_nhwc.astype(jnp.bfloat16),
                 ((0, 0), (padding, padding),
                  (padding, wp_full - w - padding),
                  (0, cin_pad - cin)))
    xp = xp.reshape(n, hp, wq, stride, cin_pad).transpose(0, 1, 3, 2, 4)
    # xp: (N, Hp, stride, Wq, Cin_pad) bf16

    def x_index(i):
        return lambda bi, hi: (bi, hi * stride + i, 0, 0, 0)

    x_specs = [pl.BlockSpec((1, 1, stride, wq, cin_pad), x_index(i)) for i in range(k)]
    w_spec = pl.BlockSpec(w_hwio.shape, lambda bi, hi: (0, 0, 0, 0))      # resident
    y_spec = pl.BlockSpec((1, 1, wo, cout_pad), lambda bi, hi: (bi, hi, 0, 0))
    st_spec = pl.BlockSpec((1, 1, 2, cout_pad), lambda bi, hi: (bi, hi, 0, 0))

    return pl.pallas_call(
        _make_conv_kernel(k, stride, wo),
        out_shape=(jax.ShapeDtypeStruct((n, ho, wo, cout_pad), jnp.float32),
                   jax.ShapeDtypeStruct((n, ho, 2, cout_pad), jnp.float32)),
        grid=(n, ho),
        in_specs=x_specs + [w_spec],
        out_specs=(y_spec, st_spec),
        compiler_params=pltpu.CompilerParams(
            dimension_semantics=("parallel", "parallel"),
            vmem_limit_bytes=VMEM_LIMIT),
    )(*([xp] * k), w_hwio.astype(jnp.bfloat16))


# ----------------------------------------------------------------------------
# Fold batch stats into per-channel scale/shift (done once, outside the tiles).
# ----------------------------------------------------------------------------
def fold_bn(stats, gamma_pad, beta_pad, count):
    s = jnp.sum(stats, axis=(0, 1))                       # (2, Cout_pad) tiny reduce
    mean = s[0] / count
    var = jnp.maximum(s[1] / count - mean * mean, 0.0)
    scale = gamma_pad * jax.lax.rsqrt(var + EPS)
    shift = beta_pad - mean * scale
    return scale.reshape(1, -1), shift.reshape(1, -1)


# ----------------------------------------------------------------------------
# Kernel 2: tiled BN apply  (y*scale+shift [+ BN(residual) or +residual] [+ReLU])
# ----------------------------------------------------------------------------
def _make_apply_kernel(mode, relu):
    def kernel(*refs):
        if mode == "bn_residual":
            y_ref, sc, sh, r_ref, rsc, rsh, o_ref = refs
        elif mode == "plain_residual":
            y_ref, sc, sh, r_ref, o_ref = refs
        else:
            y_ref, sc, sh, o_ref = refs

        out = y_ref[...] * sc[...] + sh[...]
        if mode == "bn_residual":
            out = out + (r_ref[...] * rsc[...] + rsh[...])
        elif mode == "plain_residual":
            out = out + r_ref[...].astype(jnp.float32)
        if relu:
            out = jnp.maximum(out, 0.0)
        o_ref[...] = out.astype(o_ref.dtype)

    return kernel


def bn_apply(y, scale, shift, *, relu, out_dtype,
             residual=None, res_scale=None, res_shift=None):
    m, c = y.shape
    tm = _pick_tile(m)
    row = pl.BlockSpec((tm, c), lambda i: (i, 0))
    vec = pl.BlockSpec((1, c), lambda i: (0, 0))

    inputs, specs = [y, scale, shift], [row, vec, vec]
    if residual is not None and res_scale is not None:
        mode = "bn_residual"
        inputs += [residual, res_scale, res_shift]
        specs += [row, vec, vec]
    elif residual is not None:
        mode = "plain_residual"
        inputs += [residual]
        specs += [row]
    else:
        mode = "none"

    return pl.pallas_call(
        _make_apply_kernel(mode, relu),
        out_shape=jax.ShapeDtypeStruct((m, c), out_dtype),
        grid=(m // tm,),
        in_specs=specs,
        out_specs=row,
        compiler_params=pltpu.CompilerParams(
            dimension_semantics=("parallel",),
            vmem_limit_bytes=VMEM_LIMIT),
    )(*inputs)


# ----------------------------------------------------------------------------
# BasicBlock forward
# ----------------------------------------------------------------------------
def basic_block_forward(x_nchw, params, kernel_size, stride, padding):
    n, cin, h, w = x_nchw.shape
    cout = params["gamma1"].shape[0]
    cpad = _round_up(cout, LANE)          # lane-dense output channels
    cin_p = _round_up(cin, SUBLANE)       # sublane-aligned K per tap

    # zero-pad weights / BN params once (zero rows/cols keep conv semantics)
    w1 = jnp.pad(params["w1"], ((0, 0), (0, 0), (0, cin_p - cin), (0, cpad - cout)))
    w2 = jnp.pad(params["w2"], ((0, 0), (0, 0), (0, cpad - cout), (0, cpad - cout)))
    pad_c = lambda v: jnp.pad(v, (0, cpad - v.shape[0]))
    g1, b1 = pad_c(params["gamma1"]), pad_c(params["beta1"])
    g2, b2 = pad_c(params["gamma2"]), pad_c(params["beta2"])

    x = jnp.transpose(x_nchw, (0, 2, 3, 1))    # NCHW -> NHWC (module boundary only)

    # conv1 -> bn1 -> relu
    y1, st1 = conv2d_bn_stats(x, w1, kernel_size, stride, padding)
    _, ho, wo, _ = y1.shape
    m = n * ho * wo
    sc1, sh1 = fold_bn(st1, g1, b1, m)
    out1 = bn_apply(y1.reshape(m, cpad), sc1, sh1, relu=True,
                    out_dtype=jnp.bfloat16)    # bf16: feeds conv2's MXU
    out1_nhwc = out1.reshape(n, ho, wo, cpad)

    # conv2 (stride 1) -> bn2
    y2, st2 = conv2d_bn_stats(out1_nhwc, w2, kernel_size, 1, padding)
    _, ho2, wo2, _ = y2.shape
    m2 = n * ho2 * wo2
    sc2, sh2 = fold_bn(st2, g2, b2, m2)

    if stride > 1:
        # downsample: 1x1 stride-s conv + bn, fused into the final apply kernel
        wd = jnp.pad(params["wd"], ((0, 0), (0, 0), (0, cin_p - cin), (0, cpad - cout)))
        gd, bd = pad_c(params["gammad"]), pad_c(params["betad"])
        yd, std_ = conv2d_bn_stats(x, wd, 1, stride, 0)
        assert yd.shape == y2.shape
        scd, shd = fold_bn(std_, gd, bd, m2)
        out = bn_apply(y2.reshape(m2, cpad), sc2, sh2, relu=True,
                       out_dtype=jnp.float32,
                       residual=yd.reshape(m2, cpad),
                       res_scale=scd, res_shift=shd)
    else:
        # identity residual (requires in_planes == out_planes, as in PyTorch)
        assert cin == cout, "identity residual requires in_planes == out_planes"
        assert (ho2, wo2) == (h, w), "identity residual requires shape-preserving convs"
        res = jnp.pad(x.reshape(m2, cin), ((0, 0), (0, cpad - cin)))
        out = bn_apply(y2.reshape(m2, cpad), sc2, sh2, relu=True,
                       out_dtype=jnp.float32, residual=res)

    out = out.reshape(n, ho2, wo2, cpad)[:, :, :, :cout]
    return jnp.transpose(out, (0, 3, 1, 2))    # NHWC -> NCHW


# ----------------------------------------------------------------------------
# Params (conv weights in HWIO = transpose of PyTorch's OIHW; bias=False)
# ----------------------------------------------------------------------------
def init_params(key, in_planes, out_planes, kernel_size, stride):
    k = kernel_size
    ks = jax.random.split(key, 8)
    params = {
        "w1": jax.random.normal(ks[0], (k, k, in_planes, out_planes), jnp.float32) * 0.1,
        "w2": jax.random.normal(ks[1], (k, k, out_planes, out_planes), jnp.float32) * 0.1,
        "gamma1": jax.random.normal(ks[2], (out_planes,), jnp.float32) * 0.1 + 1.0,
        "beta1": jax.random.normal(ks[3], (out_planes,), jnp.float32) * 0.1,
        "gamma2": jax.random.normal(ks[4], (out_planes,), jnp.float32) * 0.1 + 1.0,
        "beta2": jax.random.normal(ks[5], (out_planes,), jnp.float32) * 0.1,
    }
    if stride > 1:
        params["wd"] = jax.random.normal(ks[6], (1, 1, in_planes, out_planes),
                                         jnp.float32) * 0.1
        params["gammad"] = jnp.ones((out_planes,), jnp.float32)
        params["betad"] = jnp.zeros((out_planes,), jnp.float32)
    return params


# ----------------------------------------------------------------------------
# Pure-JAX reference (matches the PyTorch module in training mode, f32)
# ----------------------------------------------------------------------------
def _ref_forward(x_nchw, params, kernel_size, stride, padding):
    x = jnp.transpose(x_nchw, (0, 2, 3, 1))

    def conv(inp, w_hwio, s, p):
        return jax.lax.conv_general_dilated(
            inp, w_hwio, window_strides=(s, s), padding=((p, p), (p, p)),
            dimension_numbers=("NHWC", "HWIO", "NHWC"))

    def bn(y, gamma, beta):
        mean = jnp.mean(y, axis=(0, 1, 2))
        var = jnp.var(y, axis=(0, 1, 2))
        return (y - mean) * jax.lax.rsqrt(var + EPS) * gamma + beta

    out = jax.nn.relu(bn(conv(x, params["w1"], stride, padding),
                         params["gamma1"], params["beta1"]))
    out = bn(conv(out, params["w2"], 1, padding), params["gamma2"], params["beta2"])
    if stride > 1:
        res = bn(conv(x, params["wd"], stride, 0), params["gammad"], params["betad"])
    else:
        res = x
    out = jax.nn.relu(out + res)
    return jnp.transpose(out, (0, 3, 1, 2))


if __name__ == "__main__":
    # BasicBlock(in_planes=4, out_planes=8, kernel_size=3, stride=2, padding=1)
    N, CIN, H, W = 2, 4, 16, 16
    COUT, K, STRIDE, PAD = 8, 3, 2, 1

    key = jax.random.PRNGKey(0)
    kx, kp = jax.random.split(key)
    x = jax.random.normal(kx, (N, CIN, H, W), jnp.float32)
    params = init_params(kp, CIN, COUT, K, STRIDE)

    fwd = jax.jit(lambda xx, pp: basic_block_forward(xx, pp, K, STRIDE, PAD))
    out = jax.block_until_ready(fwd(x, params))

    assert out.shape == (N, COUT, H // STRIDE, W // STRIDE), out.shape
    assert bool(jnp.all(out >= 0.0))           # final ReLU

    ref = _ref_forward(x, params, K, STRIDE, PAD)
    max_err = float(jnp.max(jnp.abs(out - ref)))
    assert max_err < 1.5e-1, f"mismatch vs reference: {max_err}"

    print("KERNEL_OK")
</pallas_src>

<mosaic_0001>
module attributes {stable_mosaic.version = 11 : i64} {
  func.func @kernel(%arg0: i32, %arg1: i32, %arg2: memref<1x1x2x9x8xbf16, #tpu.memory_space<vmem>>, %arg3: memref<1x1x2x9x8xbf16, #tpu.memory_space<vmem>>, %arg4: memref<1x1x2x9x8xbf16, #tpu.memory_space<vmem>>, %arg5: memref<3x3x8x128xbf16, #tpu.memory_space<vmem>>, %arg6: memref<1x1x8x128xf32, #tpu.memory_space<vmem>>, %arg7: memref<1x1x2x128xf32, #tpu.memory_space<vmem>>) attributes {dimension_semantics = [#tpu.dimension_semantics<parallel>, #tpu.dimension_semantics<parallel>], iteration_bounds = array<i64: 2, 8>, scalar_prefetch = 0 : i64, scratch_operands = 0 : i64, tpu.core_type = #tpu.core_type<tc>, window_params = [{transform_indices = @transform_0, window_bounds = array<i64: 1, 1, 2, 9, 8>}, {transform_indices = @transform_1, window_bounds = array<i64: 1, 1, 2, 9, 8>}, {transform_indices = @transform_2, window_bounds = array<i64: 1, 1, 2, 9, 8>}, {pipeline_mode = #tpu.pipeline_mode<synchronous>, transform_indices = @transform_3, window_bounds = array<i64: 3, 3, 8, 128>}, {transform_indices = @transform_4, window_bounds = array<i64: 1, 1, 8, 128>}, {transform_indices = @transform_5, window_bounds = array<i64: 1, 1, 2, 128>}]} {
    %c0 = arith.constant 0 : index
    %c0_0 = arith.constant 0 : index
    %c0_1 = arith.constant 0 : index
    %c0_2 = arith.constant 0 : index
    %c0_3 = arith.constant 0 : index
    %0 = vector.load %arg2[%c0, %c0_0, %c0_1, %c0_2, %c0_3] : memref<1x1x2x9x8xbf16, #tpu.memory_space<vmem>>, vector<1x1x1x8x8xbf16>
    %1 = vector.shape_cast %0 : vector<1x1x1x8x8xbf16> to vector<8x8xbf16>
    %c0_4 = arith.constant 0 : index
    %c0_5 = arith.constant 0 : index
    %c0_6 = arith.constant 0 : index
    %c0_7 = arith.constant 0 : index
    %2 = vector.load %arg5[%c0_4, %c0_5, %c0_6, %c0_7] : memref<3x3x8x128xbf16, #tpu.memory_space<vmem>>, vector<1x1x8x128xbf16>
    %3 = vector.shape_cast %2 : vector<1x1x8x128xbf16> to vector<8x128xbf16>
    %cst = arith.constant dense<0.000000e+00> : vector<8x128xf32>
    %4 = tpu.matmul %1, %3, %cst {dimension_numbers = #tpu.dot_dimension_numbers<[1], [0], [0], [1], [0, 0, 1, 1], [], []>} : vector<8x8xbf16>, vector<8x128xbf16>, vector<8x128xf32> -> vector<8x128xf32>
    %c0_8 = arith.constant 0 : index
    %c0_9 = arith.constant 0 : index
    %c1 = arith.constant 1 : index
    %c0_10 = arith.constant 0 : index
    %c0_11 = arith.constant 0 : index
    %5 = vector.load %arg2[%c0_8, %c0_9, %c1, %c0_10, %c0_11] : memref<1x1x2x9x8xbf16, #tpu.memory_space<vmem>>, vector<1x1x1x8x8xbf16>
    %6 = vector.shape_cast %5 : vector<1x1x1x8x8xbf16> to vector<8x8xbf16>
    %c0_12 = arith.constant 0 : index
    %c1_13 = arith.constant 1 : index
    %c0_14 = arith.constant 0 : index
    %c0_15 = arith.constant 0 : index
    %7 = vector.load %arg5[%c0_12, %c1_13, %c0_14, %c0_15] : memref<3x3x8x128xbf16, #tpu.memory_space<vmem>>, vector<1x1x8x128xbf16>
    %8 = vector.shape_cast %7 : vector<1x1x8x128xbf16> to vector<8x128xbf16>
    %cst_16 = arith.constant dense<0.000000e+00> : vector<8x128xf32>
    %9 = tpu.matmul %6, %8, %cst_16 {dimension_numbers = #tpu.dot_dimension_numbers<[1], [0], [0], [1], [0, 0, 1, 1], [], []>} : vector<8x8xbf16>, vector<8x128xbf16>, vector<8x128xf32> -> vector<8x128xf32>
    %10 = arith.addf %4, %9 : vector<8x128xf32>
    %c0_17 = arith.constant 0 : index
    %c0_18 = arith.constant 0 : index
    %c0_19 = arith.constant 0 : index
    %c1_20 = arith.constant 1 : index
    %c0_21 = arith.constant 0 : index
    %11 = vector.load %arg2[%c0_17, %c0_18, %c0_19, %c1_20, %c0_21] : memref<1x1x2x9x8xbf16, #tpu.memory_space<vmem>>, vector<1x1x1x8x8xbf16>
    %12 = vector.shape_cast %11 : vector<1x1x1x8x8xbf16> to vector<8x8xbf16>
    %c0_22 = arith.constant 0 : index
    %c2 = arith.constant 2 : index
    %c0_23 = arith.constant 0 : index
    %c0_24 = arith.constant 0 : index
    %13 = vector.load %arg5[%c0_22, %c2, %c0_23, %c0_24] : memref<3x3x8x128xbf16, #tpu.memory_space<vmem>>, vector<1x1x8x128xbf16>
    %14 = vector.shape_cast %13 : vector<1x1x8x128xbf16> to vector<8x128xbf16>
    %cst_25 = arith.constant dense<0.000000e+00> : vector<8x128xf32>
    %15 = tpu.matmul %12, %14, %cst_25 {dimension_numbers = #tpu.dot_dimension_numbers<[1], [0], [0], [1], [0, 0, 1, 1], [], []>} : vector<8x8xbf16>, vector<8x128xbf16>, vector<8x128xf32> -> vector<8x128xf32>
    %16 = arith.addf %10, %15 : vector<8x128xf32>
    %c0_26 = arith.constant 0 : index
    %c0_27 = arith.constant 0 : index
    %c0_28 = arith.constant 0 : index
    %c0_29 = arith.constant 0 : index
    %c0_30 = arith.constant 0 : index
    %17 = vector.load %arg3[%c0_26, %c0_27, %c0_28, %c0_29, %c0_30] : memref<1x1x2x9x8xbf16, #tpu.memory_space<vmem>>, vector<1x1x1x8x8xbf16>
    %18 = vector.shape_cast %17 : vector<1x1x1x8x8xbf16> to vector<8x8xbf16>
    %c1_31 = arith.constant 1 : index
    %c0_32 = arith.constant 0 : index
    %c0_33 = arith.constant 0 : index
    %c0_34 = arith.constant 0 : index
    %19 = vector.load %arg5[%c1_31, %c0_32, %c0_33, %c0_34] : memref<3x3x8x128xbf16, #tpu.memory_space<vmem>>, vector<1x1x8x128xbf16>
    %20 = vector.shape_cast %19 : vector<1x1x8x128xbf16> to vector<8x128xbf16>
    %cst_35 = arith.constant dense<0.000000e+00> : vector<8x128xf32>
    %21 = tpu.matmul %18, %20, %cst_35 {dimension_numbers = #tpu.dot_dimension_numbers<[1], [0], [0], [1], [0, 0, 1, 1], [], []>} : vector<8x8xbf16>, vector<8x128xbf16>, vector<8x128xf32> -> vector<8x128xf32>
    %22 = arith.addf %16, %21 : vector<8x128xf32>
    %c0_36 = arith.constant 0 : index
    %c0_37 = arith.constant 0 : index
    %c1_38 = arith.constant 1 : index
    %c0_39 = arith.constant 0 : index
    %c0_40 = arith.constant 0 : index
    %23 = vector.load %arg3[%c0_36, %c0_37, %c1_38, %c0_39, %c0_40] : memref<1x1x2x9x8xbf16, #tpu.memory_space<vmem>>, vector<1x1x1x8x8xbf16>
    %24 = vector.shape_cast %23 : vector<1x1x1x8x8xbf16> to vector<8x8xbf16>
    %c1_41 = arith.constant 1 : index
    %c1_42 = arith.constant 1 : index
    %c0_43 = arith.constant 0 : index
    %c0_44 = arith.constant 0 : index
    %25 = vector.load %arg5[%c1_41, %c1_42, %c0_43, %c0_44] : memref<3x3x8x128xbf16, #tpu.memory_space<vmem>>, vector<1x1x8x128xbf16>
    %26 = vector.shape_cast %25 : vector<1x1x8x128xbf16> to vector<8x128xbf16>
    %cst_45 = arith.constant dense<0.000000e+00> : vector<8x128xf32>
    %27 = tpu.matmul %24, %26, %cst_45 {dimension_numbers = #tpu.dot_dimension_numbers<[1], [0], [0], [1], [0, 0, 1, 1], [], []>} : vector<8x8xbf16>, vector<8x128xbf16>, vector<8x128xf32> -> vector<8x128xf32>
    %28 = arith.addf %22, %27 : vector<8x128xf32>
    %c0_46 = arith.constant 0 : index
    %c0_47 = arith.constant 0 : index
    %c0_48 = arith.constant 0 : index
    %c1_49 = arith.constant 1 : index
    %c0_50 = arith.constant 0 : index
    %29 = vector.load %arg3[%c0_46, %c0_47, %c0_48, %c1_49, %c0_50] : memref<1x1x2x9x8xbf16, #tpu.memory_space<vmem>>, vector<1x1x1x8x8xbf16>
    %30 = vector.shape_cast %29 : vector<1x1x1x8x8xbf16> to vector<8x8xbf16>
    %c1_51 = arith.constant 1 : index
    %c2_52 = arith.constant 2 : index
    %c0_53 = arith.constant 0 : index
    %c0_54 = arith.constant 0 : index
    %31 = vector.load %arg5[%c1_51, %c2_52, %c0_53, %c0_54] : memref<3x3x8x128xbf16, #tpu.memory_space<vmem>>, vector<1x1x8x128xbf16>
    %32 = vector.shape_cast %31 : vector<1x1x8x128xbf16> to vector<8x128xbf16>
    %cst_55 = arith.constant dense<0.000000e+00> : vector<8x128xf32>
    %33 = tpu.matmul %30, %32, %cst_55 {dimension_numbers = #tpu.dot_dimension_numbers<[1], [0], [0], [1], [0, 0, 1, 1], [], []>} : vector<8x8xbf16>, vector<8x128xbf16>, vector<8x128xf32> -> vector<8x128xf32>
    %34 = arith.addf %28, %33 : vector<8x128xf32>
    %c0_56 = arith.constant 0 : index
    %c0_57 = arith.constant 0 : index
    %c0_58 = arith.constant 0 : index
    %c0_59 = arith.constant 0 : index
    %c0_60 = arith.constant 0 : index
    %35 = vector.load %arg4[%c0_56, %c0_57, %c0_58, %c0_59, %c0_60] : memref<1x1x2x9x8xbf16, #tpu.memory_space<vmem>>, vector<1x1x1x8x8xbf16>
    %36 = vector.shape_cast %35 : vector<1x1x1x8x8xbf16> to vector<8x8xbf16>
    %c2_61 = arith.constant 2 : index
    %c0_62 = arith.constant 0 : index
    %c0_63 = arith.constant 0 : index
    %c0_64 = arith.constant 0 : index
    %37 = vector.load %arg5[%c2_61, %c0_62, %c0_63, %c0_64] : memref<3x3x8x128xbf16, #tpu.memory_space<vmem>>, vector<1x1x8x128xbf16>
    %38 = vector.shape_cast %37 : vector<1x1x8x128xbf16> to vector<8x128xbf16>
    %cst_65 = arith.constant dense<0.000000e+00> : vector<8x128xf32>
    %39 = tpu.matmul %36, %38, %cst_65 {dimension_numbers = #tpu.dot_dimension_numbers<[1], [0], [0], [1], [0, 0, 1, 1], [], []>} : vector<8x8xbf16>, vector<8x128xbf16>, vector<8x128xf32> -> vector<8x128xf32>
    %40 = arith.addf %34, %39 : vector<8x128xf32>
    %c0_66 = arith.constant 0 : index
    %c0_67 = arith.constant 0 : index
    %c1_68 = arith.constant 1 : index
    %c0_69 = arith.constant 0 : index
    %c0_70 = arith.constant 0 : index
    %41 = vector.load %arg4[%c0_66, %c0_67, %c1_68, %c0_69, %c0_70] : memref<1x1x2x9x8xbf16, #tpu.memory_space<vmem>>, vector<1x1x1x8x8xbf16>
    %42 = vector.shape_cast %41 : vector<1x1x1x8x8xbf16> to vector<8x8xbf16>
    %c2_71 = arith.constant 2 : index
    %c1_72 = arith.constant 1 : index
    %c0_73 = arith.constant 0 : index
    %c0_74 = arith.constant 0 : index
    %43 = vector.load %arg5[%c2_71, %c1_72, %c0_73, %c0_74] : memref<3x3x8x128xbf16, #tpu.memory_space<vmem>>, vector<1x1x8x128xbf16>
    %44 = vector.shape_cast %43 : vector<1x1x8x128xbf16> to vector<8x128xbf16>
    %cst_75 = arith.constant dense<0.000000e+00> : vector<8x128xf32>
    %45 = tpu.matmul %42, %44, %cst_75 {dimension_numbers = #tpu.dot_dimension_numbers<[1], [0], [0], [1], [0, 0, 1, 1], [], []>} : vector<8x8xbf16>, vector<8x128xbf16>, vector<8x128xf32> -> vector<8x128xf32>
    %46 = arith.addf %40, %45 : vector<8x128xf32>
    %c0_76 = arith.constant 0 : index
    %c0_77 = arith.constant 0 : index
    %c0_78 = arith.constant 0 : index
    %c1_79 = arith.constant 1 : index
    %c0_80 = arith.constant 0 : index
    %47 = vector.load %arg4[%c0_76, %c0_77, %c0_78, %c1_79, %c0_80] : memref<1x1x2x9x8xbf16, #tpu.memory_space<vmem>>, vector<1x1x1x8x8xbf16>
    %48 = vector.shape_cast %47 : vector<1x1x1x8x8xbf16> to vector<8x8xbf16>
    %c2_81 = arith.constant 2 : index
    %c2_82 = arith.constant 2 : index
    %c0_83 = arith.constant 0 : index
    %c0_84 = arith.constant 0 : index
    %49 = vector.load %arg5[%c2_81, %c2_82, %c0_83, %c0_84] : memref<3x3x8x128xbf16, #tpu.memory_space<vmem>>, vector<1x1x8x128xbf16>
    %50 = vector.shape_cast %49 : vector<1x1x8x128xbf16> to vector<8x128xbf16>
    %cst_85 = arith.constant dense<0.000000e+00> : vector<8x128xf32>
    %51 = tpu.matmul %48, %50, %cst_85 {dimension_numbers = #tpu.dot_dimension_numbers<[1], [0], [0], [1], [0, 0, 1, 1], [], []>} : vector<8x8xbf16>, vector<8x128xbf16>, vector<8x128xf32> -> vector<8x128xf32>
    %52 = arith.addf %46, %51 : vector<8x128xf32>
    %c0_86 = arith.constant 0 : index
    %c0_87 = arith.constant 0 : index
    %c0_88 = arith.constant 0 : index
    %c0_89 = arith.constant 0 : index
    %53 = vector.load %arg6[%c0_86, %c0_87, %c0_88, %c0_89] : memref<1x1x8x128xf32, #tpu.memory_space<vmem>>, vector<1x1x8x128xf32>
    %54 = vector.shape_cast %53 : vector<1x1x8x128xf32> to vector<8x128xf32>
    %55 = vector.shape_cast %52 : vector<8x128xf32> to vector<1x1x8x128xf32>
    tpu.vector_store %arg6[%c0_86, %c0_87, %c0_88, %c0_89], %55 {strides = array<i32>} : memref<1x1x8x128xf32, #tpu.memory_space<vmem>>, vector<1x1x8x128xf32>,
    %cst_90 = arith.constant dense<0.000000e+00> : vector<128xf32>
    %56 = vector.multi_reduction <add>, %52, %cst_90 [0] : vector<8x128xf32> to vector<128xf32>
    %57 = vector.shape_cast %56 : vector<128xf32> to vector<1x128xf32>
    %c0_91 = arith.constant 0 : index
    %c0_92 = arith.constant 0 : index
    %c0_93 = arith.constant 0 : index
    %c0_94 = arith.constant 0 : index
    %58 = vector.load %arg7[%c0_91, %c0_92, %c0_93, %c0_94] : memref<1x1x2x128xf32, #tpu.memory_space<vmem>>, vector<1x1x1x128xf32>
    %59 = vector.shape_cast %58 : vector<1x1x1x128xf32> to vector<1x128xf32>
    %60 = vector.shape_cast %57 : vector<1x128xf32> to vector<1x1x1x128xf32>
    tpu.vector_store %arg7[%c0_91, %c0_92, %c0_93, %c0_94], %60 {strides = array<i32>} : memref<1x1x2x128xf32, #tpu.memory_space<vmem>>, vector<1x1x1x128xf32>,
    %61 = arith.mulf %52, %52 : vector<8x128xf32>
    %cst_95 = arith.constant dense<0.000000e+00> : vector<128xf32>
    %62 = vector.multi_reduction <add>, %61, %cst_95 [0] : vector<8x128xf32> to vector<128xf32>
    %63 = vector.shape_cast %62 : vector<128xf32> to vector<1x128xf32>
    %c0_96 = arith.constant 0 : index
    %c0_97 = arith.constant 0 : index
    %c1_98 = arith.constant 1 : index
    %c0_99 = arith.constant 0 : index
    %64 = vector.load %arg7[%c0_96, %c0_97, %c1_98, %c0_99] : memref<1x1x2x128xf32, #tpu.memory_space<vmem>>, vector<1x1x1x128xf32>
    %65 = vector.shape_cast %64 : vector<1x1x1x128xf32> to vector<1x128xf32>
    %66 = vector.shape_cast %63 : vector<1x128xf32> to vector<1x1x1x128xf32>
    tpu.vector_store %arg7[%c0_96, %c0_97, %c1_98, %c0_99], %66 {strides = array<i32>} : memref<1x1x2x128xf32, #tpu.memory_space<vmem>>, vector<1x1x1x128xf32>,
    return
  }
  func.func @transform_0(%arg0: i32, %arg1: i32) -> (i32, i32, i32, i32, i32) {
    %c2_i32 = arith.constant 2 : i32
    %0 = arith.muli %arg1, %c2_i32 : i32
    %c0_i32 = arith.constant 0 : i32
    %1 = arith.addi %0, %c0_i32 : i32
    %c0_i32_0 = arith.constant 0 : i32
    %c0_i32_1 = arith.constant 0 : i32
    %c0_i32_2 = arith.constant 0 : i32
    %c0_i32_3 = arith.constant 0 : i32
    return %arg0, %1, %c0_i32_0, %c0_i32_1, %c0_i32_2 : i32, i32, i32, i32, i32
  }
  func.func @transform_1(%arg0: i32, %arg1: i32) -> (i32, i32, i32, i32, i32) {
    %c2_i32 = arith.constant 2 : i32
    %0 = arith.muli %arg1, %c2_i32 : i32
    %c1_i32 = arith.constant 1 : i32
    %1 = arith.addi %0, %c1_i32 : i32
    %c0_i32 = arith.constant 0 : i32
    %c0_i32_0 = arith.constant 0 : i32
    %c0_i32_1 = arith.constant 0 : i32
    %c0_i32_2 = arith.constant 0 : i32
    return %arg0, %1, %c0_i32, %c0_i32_0, %c0_i32_1 : i32, i32, i32, i32, i32
  }
  func.func @transform_2(%arg0: i32, %arg1: i32) -> (i32, i32, i32, i32, i32) {
    %c2_i32 = arith.constant 2 : i32
    %0 = arith.muli %arg1, %c2_i32 : i32
    %c2_i32_0 = arith.constant 2 : i32
    %1 = arith.addi %0, %c2_i32_0 : i32
    %c0_i32 = arith.constant 0 : i32
    %c0_i32_1 = arith.constant 0 : i32
    %c0_i32_2 = arith.constant 0 : i32
    %c0_i32_3 = arith.constant 0 : i32
    return %arg0, %1, %c0_i32, %c0_i32_1, %c0_i32_2 : i32, i32, i32, i32, i32
  }
  func.func @transform_3(%arg0: i32, %arg1: i32) -> (i32, i32, i32, i32) {
    %c0_i32 = arith.constant 0 : i32
    %c0_i32_0 = arith.constant 0 : i32
    %c0_i32_1 = arith.constant 0 : i32
    %c0_i32_2 = arith.constant 0 : i32
    %c0_i32_3 = arith.constant 0 : i32
    return %c0_i32, %c0_i32_0, %c0_i32_1, %c0_i32_2 : i32, i32, i32, i32
  }
  func.func @transform_4(%arg0: i32, %arg1: i32) -> (i32, i32, i32, i32) {
    %c0_i32 = arith.constant 0 : i32
    %c0_i32_0 = arith.constant 0 : i32
    %c0_i32_1 = arith.constant 0 : i32
    return %arg0, %arg1, %c0_i32, %c0_i32_0 : i32, i32, i32, i32
  }
  func.func @transform_5(%arg0: i32, %arg1: i32) -> (i32, i32, i32, i32) {
    %c0_i32 = arith.constant 0 : i32
    %c0_i32_0 = arith.constant 0 : i32
    %c0_i32_1 = arith.constant 0 : i32
    return %arg0, %arg1, %c0_i32, %c0_i32_0 : i32, i32, i32, i32
  }
}

module attributes {stable_mosaic.version = 11 : i64} {
  func.func @kernel(%arg0: i32, %arg1: memref<128x128xf32, #tpu.memory_space<vmem>>, %arg2: memref<1x128xf32, #tpu.memory_space<vmem>>, %arg3: memref<1x128xf32, #tpu.memory_space<vmem>>, %arg4: memref<128x128xbf16, #tpu.memory_space<vmem>>) attributes {dimension_semantics = [#tpu.dimension_semantics<parallel>], iteration_bounds = array<i64: 1>, scalar_prefetch = 0 : i64, scratch_operands = 0 : i64, tpu.core_type = #tpu.core_type<tc>, window_params = [{transform_indices = @transform_0, window_bounds = array<i64: 128, 128>}, {pipeline_mode = #tpu.pipeline_mode<synchronous>, transform_indices = @transform_1, window_bounds = array<i64: 1, 128>}, {pipeline_mode = #tpu.pipeline_mode<synchronous>, transform_indices = @transform_2, window_bounds = array<i64: 1, 128>}, {transform_indices = @transform_3, window_bounds = array<i64: 128, 128>}]} {
    %c0 = arith.constant 0 : index
    %c0_0 = arith.constant 0 : index
    %0 = vector.load %arg1[%c0, %c0_0] : memref<128x128xf32, #tpu.memory_space<vmem>>, vector<128x128xf32>
    %c0_1 = arith.constant 0 : index
    %c0_2 = arith.constant 0 : index
    %1 = vector.load %arg2[%c0_1, %c0_2] : memref<1x128xf32, #tpu.memory_space<vmem>>, vector<1x128xf32>
    %2 = vector.broadcast %1 : vector<1x128xf32> to vector<128x128xf32>
    %3 = arith.mulf %0, %2 : vector<128x128xf32>
    %c0_3 = arith.constant 0 : index
    %c0_4 = arith.constant 0 : index
    %4 = vector.load %arg3[%c0_3, %c0_4] : memref<1x128xf32, #tpu.memory_space<vmem>>, vector<1x128xf32>
    %5 = vector.broadcast %4 : vector<1x128xf32> to vector<128x128xf32>
    %6 = arith.addf %3, %5 : vector<128x128xf32>
    %cst = arith.constant 0.000000e+00 : f32
    %7 = vector.broadcast %cst : f32 to vector<128x128xf32>
    %8 = arith.maximumf %6, %7 : vector<128x128xf32>
    %9 = arith.truncf %8 : vector<128x128xf32> to vector<128x128xbf16>
    %c0_5 = arith.constant 0 : index
    %c0_6 = arith.constant 0 : index
    %10 = vector.load %arg4[%c0_5, %c0_6] : memref<128x128xbf16, #tpu.memory_space<vmem>>, vector<128x128xbf16>
    tpu.vector_store %arg4[%c0_5, %c0_6], %9 {strides = array<i32>} : memref<128x128xbf16, #tpu.memory_space<vmem>>, vector<128x128xbf16>,
    return
  }
  func.func @transform_0(%arg0: i32) -> (i32, i32) {
    %c0_i32 = arith.constant 0 : i32
    %c0_i32_0 = arith.constant 0 : i32
    return %arg0, %c0_i32 : i32, i32
  }
  func.func @transform_1(%arg0: i32) -> (i32, i32) {
    %c0_i32 = arith.constant 0 : i32
    %c0_i32_0 = arith.constant 0 : i32
    %c0_i32_1 = arith.constant 0 : i32
    return %c0_i32, %c0_i32_0 : i32, i32
  }
  func.func @transform_2(%arg0: i32) -> (i32, i32) {
    %c0_i32 = arith.constant 0 : i32
    %c0_i32_0 = arith.constant 0 : i32
    %c0_i32_1 = arith.constant 0 : i32
    return %c0_i32, %c0_i32_0 : i32, i32
  }
  func.func @transform_3(%arg0: i32) -> (i32, i32) {
    %c0_i32 = arith.constant 0 : i32
    %c0_i32_0 = arith.constant 0 : i32
    return %arg0, %c0_i32 : i32, i32
  }
}

module attributes {stable_mosaic.version = 11 : i64} {
  func.func @kernel(%arg0: i32, %arg1: i32, %arg2: memref<1x1x1x10x128xbf16, #tpu.memory_space<vmem>>, %arg3: memref<1x1x1x10x128xbf16, #tpu.memory_space<vmem>>, %arg4: memref<1x1x1x10x128xbf16, #tpu.memory_space<vmem>>, %arg5: memref<3x3x128x128xbf16, #tpu.memory_space<vmem>>, %arg6: memref<1x1x8x128xf32, #tpu.memory_space<vmem>>, %arg7: memref<1x1x2x128xf32, #tpu.memory_space<vmem>>) attributes {dimension_semantics = [#tpu.dimension_semantics<parallel>, #tpu.dimension_semantics<parallel>], iteration_bounds = array<i64: 2, 8>, scalar_prefetch = 0 : i64, scratch_operands = 0 : i64, tpu.core_type = #tpu.core_type<tc>, window_params = [{transform_indices = @transform_0, window_bounds = array<i64: 1, 1, 1, 10, 128>}, {transform_indices = @transform_1, window_bounds = array<i64: 1, 1, 1, 10, 128>}, {transform_indices = @transform_2, window_bounds = array<i64: 1, 1, 1, 10, 128>}, {pipeline_mode = #tpu.pipeline_mode<synchronous>, transform_indices = @transform_3, window_bounds = array<i64: 3, 3, 128, 128>}, {transform_indices = @transform_4, window_bounds = array<i64: 1, 1, 8, 128>}, {transform_indices = @transform_5, window_bounds = array<i64: 1, 1, 2, 128>}]} {
    %c0 = arith.constant 0 : index
    %c0_0 = arith.constant 0 : index
    %c0_1 = arith.constant 0 : index
    %c0_2 = arith.constant 0 : index
    %c0_3 = arith.constant 0 : index
    %0 = vector.load %arg2[%c0, %c0_0, %c0_1, %c0_2, %c0_3] : memref<1x1x1x10x128xbf16, #tpu.memory_space<vmem>>, vector<1x1x1x8x128xbf16>
    %1 = vector.shape_cast %0 : vector<1x1x1x8x128xbf16> to vector<8x128xbf16>
    %c0_4 = arith.constant 0 : index
    %c0_5 = arith.constant 0 : index
    %c0_6 = arith.constant 0 : index
    %c0_7 = arith.constant 0 : index
    %2 = vector.load %arg5[%c0_4, %c0_5, %c0_6, %c0_7] : memref<3x3x128x128xbf16, #tpu.memory_space<vmem>>, vector<1x1x128x128xbf16>
    %3 = vector.shape_cast %2 : vector<1x1x128x128xbf16> to vector<128x128xbf16>
    %cst = arith.constant dense<0.000000e+00> : vector<8x128xf32>
    %4 = tpu.matmul %1, %3, %cst {dimension_numbers = #tpu.dot_dimension_numbers<[1], [0], [0], [1], [0, 0, 1, 1], [], []>} : vector<8x128xbf16>, vector<128x128xbf16>, vector<8x128xf32> -> vector<8x128xf32>
    %c0_8 = arith.constant 0 : index
    %c0_9 = arith.constant 0 : index
    %c0_10 = arith.constant 0 : index
    %c1 = arith.constant 1 : index
    %c0_11 = arith.constant 0 : index
    %5 = vector.load %arg2[%c0_8, %c0_9, %c0_10, %c1, %c0_11] : memref<1x1x1x10x128xbf16, #tpu.memory_space<vmem>>, vector<1x1x1x8x128xbf16>
    %6 = vector.shape_cast %5 : vector<1x1x1x8x128xbf16> to vector<8x128xbf16>
    %c0_12 = arith.constant 0 : index
    %c1_13 = arith.constant 1 : index
    %c0_14 = arith.constant 0 : index
    %c0_15 = arith.constant 0 : index
    %7 = vector.load %arg5[%c0_12, %c1_13, %c0_14, %c0_15] : memref<3x3x128x128xbf16, #tpu.memory_space<vmem>>, vector<1x1x128x128xbf16>
    %8 = vector.shape_cast %7 : vector<1x1x128x128xbf16> to vector<128x128xbf16>
    %cst_16 = arith.constant dense<0.000000e+00> : vector<8x128xf32>
    %9 = tpu.matmul %6, %8, %cst_16 {dimension_numbers = #tpu.dot_dimension_numbers<[1], [0], [0], [1], [0, 0, 1, 1], [], []>} : vector<8x128xbf16>, vector<128x128xbf16>, vector<8x128xf32> -> vector<8x128xf32>
    %10 = arith.addf %4, %9 : vector<8x128xf32>
    %c0_17 = arith.constant 0 : index
    %c0_18 = arith.constant 0 : index
    %c0_19 = arith.constant 0 : index
    %c2 = arith.constant 2 : index
    %c0_20 = arith.constant 0 : index
    %11 = vector.load %arg2[%c0_17, %c0_18, %c0_19, %c2, %c0_20] : memref<1x1x1x10x128xbf16, #tpu.memory_space<vmem>>, vector<1x1x1x8x128xbf16>
    %12 = vector.shape_cast %11 : vector<1x1x1x8x128xbf16> to vector<8x128xbf16>
    %c0_21 = arith.constant 0 : index
    %c2_22 = arith.constant 2 : index
    %c0_23 = arith.constant 0 : index
    %c0_24 = arith.constant 0 : index
    %13 = vector.load %arg5[%c0_21, %c2_22, %c0_23, %c0_24] : memref<3x3x128x128xbf16, #tpu.memory_space<vmem>>, vector<1x1x128x128xbf16>
    %14 = vector.shape_cast %13 : vector<1x1x128x128xbf16> to vector<128x128xbf16>
    %cst_25 = arith.constant dense<0.000000e+00> : vector<8x128xf32>
    %15 = tpu.matmul %12, %14, %cst_25 {dimension_numbers = #tpu.dot_dimension_numbers<[1], [0], [0], [1], [0, 0, 1, 1], [], []>} : vector<8x128xbf16>, vector<128x128xbf16>, vector<8x128xf32> -> vector<8x128xf32>
    %16 = arith.addf %10, %15 : vector<8x128xf32>
    %c0_26 = arith.constant 0 : index
    %c0_27 = arith.constant 0 : index
    %c0_28 = arith.constant 0 : index
    %c0_29 = arith.constant 0 : index
    %c0_30 = arith.constant 0 : index
    %17 = vector.load %arg3[%c0_26, %c0_27, %c0_28, %c0_29, %c0_30] : memref<1x1x1x10x128xbf16, #tpu.memory_space<vmem>>, vector<1x1x1x8x128xbf16>
    %18 = vector.shape_cast %17 : vector<1x1x1x8x128xbf16> to vector<8x128xbf16>
    %c1_31 = arith.constant 1 : index
    %c0_32 = arith.constant 0 : index
    %c0_33 = arith.constant 0 : index
    %c0_34 = arith.constant 0 : index
    %19 = vector.load %arg5[%c1_31, %c0_32, %c0_33, %c0_34] : memref<3x3x128x128xbf16, #tpu.memory_space<vmem>>, vector<1x1x128x128xbf16>
    %20 = vector.shape_cast %19 : vector<1x1x128x128xbf16> to vector<128x128xbf16>
    %cst_35 = arith.constant dense<0.000000e+00> : vector<8x128xf32>
    %21 = tpu.matmul %18, %20, %cst_35 {dimension_numbers = #tpu.dot_dimension_numbers<[1], [0], [0], [1], [0, 0, 1, 1], [], []>} : vector<8x128xbf16>, vector<128x128xbf16>, vector<8x128xf32> -> vector<8x128xf32>
    %22 = arith.addf %16, %21 : vector<8x128xf32>
    %c0_36 = arith.constant 0 : index
    %c0_37 = arith.constant 0 : index
    %c0_38 = arith.constant 0 : index
    %c1_39 = arith.constant 1 : index
    %c0_40 = arith.constant 0 : index
    %23 = vector.load %arg3[%c0_36, %c0_37, %c0_38, %c1_39, %c0_40] : memref<1x1x1x10x128xbf16, #tpu.memory_space<vmem>>, vector<1x1x1x8x128xbf16>
    %24 = vector.shape_cast %23 : vector<1x1x1x8x128xbf16> to vector<8x128xbf16>
    %c1_41 = arith.constant 1 : index
    %c1_42 = arith.constant 1 : index
    %c0_43 = arith.constant 0 : index
    %c0_44 = arith.constant 0 : index
    %25 = vector.load %arg5[%c1_41, %c1_42, %c0_43, %c0_44] : memref<3x3x128x128xbf16, #tpu.memory_space<vmem>>, vector<1x1x128x128xbf16>
    %26 = vector.shape_cast %25 : vector<1x1x128x128xbf16> to vector<128x128xbf16>
    %cst_45 = arith.constant dense<0.000000e+00> : vector<8x128xf32>
    %27 = tpu.matmul %24, %26, %cst_45 {dimension_numbers = #tpu.dot_dimension_numbers<[1], [0], [0], [1], [0, 0, 1, 1], [], []>} : vector<8x128xbf16>, vector<128x128xbf16>, vector<8x128xf32> -> vector<8x128xf32>
    %28 = arith.addf %22, %27 : vector<8x128xf32>
    %c0_46 = arith.constant 0 : index
    %c0_47 = arith.constant 0 : index
    %c0_48 = arith.constant 0 : index
    %c2_49 = arith.constant 2 : index
    %c0_50 = arith.constant 0 : index
    %29 = vector.load %arg3[%c0_46, %c0_47, %c0_48, %c2_49, %c0_50] : memref<1x1x1x10x128xbf16, #tpu.memory_space<vmem>>, vector<1x1x1x8x128xbf16>
    %30 = vector.shape_cast %29 : vector<1x1x1x8x128xbf16> to vector<8x128xbf16>
    %c1_51 = arith.constant 1 : index
    %c2_52 = arith.constant 2 : index
    %c0_53 = arith.constant 0 : index
    %c0_54 = arith.constant 0 : index
    %31 = vector.load %arg5[%c1_51, %c2_52, %c0_53, %c0_54] : memref<3x3x128x128xbf16, #tpu.memory_space<vmem>>, vector<1x1x128x128xbf16>
    %32 = vector.shape_cast %31 : vector<1x1x128x128xbf16> to vector<128x128xbf16>
    %cst_55 = arith.constant dense<0.000000e+00> : vector<8x128xf32>
    %33 = tpu.matmul %30, %32, %cst_55 {dimension_numbers = #tpu.dot_dimension_numbers<[1], [0], [0], [1], [0, 0, 1, 1], [], []>} : vector<8x128xbf16>, vector<128x128xbf16>, vector<8x128xf32> -> vector<8x128xf32>
    %34 = arith.addf %28, %33 : vector<8x128xf32>
    %c0_56 = arith.constant 0 : index
    %c0_57 = arith.constant 0 : index
    %c0_58 = arith.constant 0 : index
    %c0_59 = arith.constant 0 : index
    %c0_60 = arith.constant 0 : index
    %35 = vector.load %arg4[%c0_56, %c0_57, %c0_58, %c0_59, %c0_60] : memref<1x1x1x10x128xbf16, #tpu.memory_space<vmem>>, vector<1x1x1x8x128xbf16>
    %36 = vector.shape_cast %35 : vector<1x1x1x8x128xbf16> to vector<8x128xbf16>
    %c2_61 = arith.constant 2 : index
    %c0_62 = arith.constant 0 : index
    %c0_63 = arith.constant 0 : index
    %c0_64 = arith.constant 0 : index
    %37 = vector.load %arg5[%c2_61, %c0_62, %c0_63, %c0_64] : memref<3x3x128x128xbf16, #tpu.memory_space<vmem>>, vector<1x1x128x128xbf16>
    %38 = vector.shape_cast %37 : vector<1x1x128x128xbf16> to vector<128x128xbf16>
    %cst_65 = arith.constant dense<0.000000e+00> : vector<8x128xf32>
    %39 = tpu.matmul %36, %38, %cst_65 {dimension_numbers = #tpu.dot_dimension_numbers<[1], [0], [0], [1], [0, 0, 1, 1], [], []>} : vector<8x128xbf16>, vector<128x128xbf16>, vector<8x128xf32> -> vector<8x128xf32>
    %40 = arith.addf %34, %39 : vector<8x128xf32>
    %c0_66 = arith.constant 0 : index
    %c0_67 = arith.constant 0 : index
    %c0_68 = arith.constant 0 : index
    %c1_69 = arith.constant 1 : index
    %c0_70 = arith.constant 0 : index
    %41 = vector.load %arg4[%c0_66, %c0_67, %c0_68, %c1_69, %c0_70] : memref<1x1x1x10x128xbf16, #tpu.memory_space<vmem>>, vector<1x1x1x8x128xbf16>
    %42 = vector.shape_cast %41 : vector<1x1x1x8x128xbf16> to vector<8x128xbf16>
    %c2_71 = arith.constant 2 : index
    %c1_72 = arith.constant 1 : index
    %c0_73 = arith.constant 0 : index
    %c0_74 = arith.constant 0 : index
    %43 = vector.load %arg5[%c2_71, %c1_72, %c0_73, %c0_74] : memref<3x3x128x128xbf16, #tpu.memory_space<vmem>>, vector<1x1x128x128xbf16>
    %44 = vector.shape_cast %43 : vector<1x1x128x128xbf16> to vector<128x128xbf16>
    %cst_75 = arith.constant dense<0.000000e+00> : vector<8x128xf32>
    %45 = tpu.matmul %42, %44, %cst_75 {dimension_numbers = #tpu.dot_dimension_numbers<[1], [0], [0], [1], [0, 0, 1, 1], [], []>} : vector<8x128xbf16>, vector<128x128xbf16>, vector<8x128xf32> -> vector<8x128xf32>
    %46 = arith.addf %40, %45 : vector<8x128xf32>
    %c0_76 = arith.constant 0 : index
    %c0_77 = arith.constant 0 : index
    %c0_78 = arith.constant 0 : index
    %c2_79 = arith.constant 2 : index
    %c0_80 = arith.constant 0 : index
    %47 = vector.load %arg4[%c0_76, %c0_77, %c0_78, %c2_79, %c0_80] : memref<1x1x1x10x128xbf16, #tpu.memory_space<vmem>>, vector<1x1x1x8x128xbf16>
    %48 = vector.shape_cast %47 : vector<1x1x1x8x128xbf16> to vector<8x128xbf16>
    %c2_81 = arith.constant 2 : index
    %c2_82 = arith.constant 2 : index
    %c0_83 = arith.constant 0 : index
    %c0_84 = arith.constant 0 : index
    %49 = vector.load %arg5[%c2_81, %c2_82, %c0_83, %c0_84] : memref<3x3x128x128xbf16, #tpu.memory_space<vmem>>, vector<1x1x128x128xbf16>
    %50 = vector.shape_cast %49 : vector<1x1x128x128xbf16> to vector<128x128xbf16>
    %cst_85 = arith.constant dense<0.000000e+00> : vector<8x128xf32>
    %51 = tpu.matmul %48, %50, %cst_85 {dimension_numbers = #tpu.dot_dimension_numbers<[1], [0], [0], [1], [0, 0, 1, 1], [], []>} : vector<8x128xbf16>, vector<128x128xbf16>, vector<8x128xf32> -> vector<8x128xf32>
    %52 = arith.addf %46, %51 : vector<8x128xf32>
    %c0_86 = arith.constant 0 : index
    %c0_87 = arith.constant 0 : index
    %c0_88 = arith.constant 0 : index
    %c0_89 = arith.constant 0 : index
    %53 = vector.load %arg6[%c0_86, %c0_87, %c0_88, %c0_89] : memref<1x1x8x128xf32, #tpu.memory_space<vmem>>, vector<1x1x8x128xf32>
    %54 = vector.shape_cast %53 : vector<1x1x8x128xf32> to vector<8x128xf32>
    %55 = vector.shape_cast %52 : vector<8x128xf32> to vector<1x1x8x128xf32>
    tpu.vector_store %arg6[%c0_86, %c0_87, %c0_88, %c0_89], %55 {strides = array<i32>} : memref<1x1x8x128xf32, #tpu.memory_space<vmem>>, vector<1x1x8x128xf32>,
    %cst_90 = arith.constant dense<0.000000e+00> : vector<128xf32>
    %56 = vector.multi_reduction <add>, %52, %cst_90 [0] : vector<8x128xf32> to vector<128xf32>
    %57 = vector.shape_cast %56 : vector<128xf32> to vector<1x128xf32>
    %c0_91 = arith.constant 0 : index
    %c0_92 = arith.constant 0 : index
    %c0_93 = arith.constant 0 : index
    %c0_94 = arith.constant 0 : index
    %58 = vector.load %arg7[%c0_91, %c0_92, %c0_93, %c0_94] : memref<1x1x2x128xf32, #tpu.memory_space<vmem>>, vector<1x1x1x128xf32>
    %59 = vector.shape_cast %58 : vector<1x1x1x128xf32> to vector<1x128xf32>
    %60 = vector.shape_cast %57 : vector<1x128xf32> to vector<1x1x1x128xf32>
    tpu.vector_store %arg7[%c0_91, %c0_92, %c0_93, %c0_94], %60 {strides = array<i32>} : memref<1x1x2x128xf32, #tpu.memory_space<vmem>>, vector<1x1x1x128xf32>,
    %61 = arith.mulf %52, %52 : vector<8x128xf32>
    %cst_95 = arith.constant dense<0.000000e+00> : vector<128xf32>
    %62 = vector.multi_reduction <add>, %61, %cst_95 [0] : vector<8x128xf32> to vector<128xf32>
    %63 = vector.shape_cast %62 : vector<128xf32> to vector<1x128xf32>
    %c0_96 = arith.constant 0 : index
    %c0_97 = arith.constant 0 : index
    %c1_98 = arith.constant 1 : index
    %c0_99 = arith.constant 0 : index
    %64 = vector.load %arg7[%c0_96, %c0_97, %c1_98, %c0_99] : memref<1x1x2x128xf32, #tpu.memory_space<vmem>>, vector<1x1x1x128xf32>
    %65 = vector.shape_cast %64 : vector<1x1x1x128xf32> to vector<1x128xf32>
    %66 = vector.shape_cast %63 : vector<1x128xf32> to vector<1x1x1x128xf32>
    tpu.vector_store %arg7[%c0_96, %c0_97, %c1_98, %c0_99], %66 {strides = array<i32>} : memref<1x1x2x128xf32, #tpu.memory_space<vmem>>, vector<1x1x1x128xf32>,
    return
  }
  func.func @transform_0(%arg0: i32, %arg1: i32) -> (i32, i32, i32, i32, i32) {
    %c1_i32 = arith.constant 1 : i32
    %0 = arith.muli %arg1, %c1_i32 : i32
    %c0_i32 = arith.constant 0 : i32
    %1 = arith.addi %0, %c0_i32 : i32
    %c0_i32_0 = arith.constant 0 : i32
    %c0_i32_1 = arith.constant 0 : i32
    %c0_i32_2 = arith.constant 0 : i32
    %c0_i32_3 = arith.constant 0 : i32
    return %arg0, %1, %c0_i32_0, %c0_i32_1, %c0_i32_2 : i32, i32, i32, i32, i32
  }
  func.func @transform_1(%arg0: i32, %arg1: i32) -> (i32, i32, i32, i32, i32) {
    %c1_i32 = arith.constant 1 : i32
    %0 = arith.muli %arg1, %c1_i32 : i32
    %c1_i32_0 = arith.constant 1 : i32
    %1 = arith.addi %0, %c1_i32_0 : i32
    %c0_i32 = arith.constant 0 : i32
    %c0_i32_1 = arith.constant 0 : i32
    %c0_i32_2 = arith.constant 0 : i32
    %c0_i32_3 = arith.constant 0 : i32
    return %arg0, %1, %c0_i32, %c0_i32_1, %c0_i32_2 : i32, i32, i32, i32, i32
  }
  func.func @transform_2(%arg0: i32, %arg1: i32) -> (i32, i32, i32, i32, i32) {
    %c1_i32 = arith.constant 1 : i32
    %0 = arith.muli %arg1, %c1_i32 : i32
    %c2_i32 = arith.constant 2 : i32
    %1 = arith.addi %0, %c2_i32 : i32
    %c0_i32 = arith.constant 0 : i32
    %c0_i32_0 = arith.constant 0 : i32
    %c0_i32_1 = arith.constant 0 : i32
    %c0_i32_2 = arith.constant 0 : i32
    return %arg0, %1, %c0_i32, %c0_i32_0, %c0_i32_1 : i32, i32, i32, i32, i32
  }
  func.func @transform_3(%arg0: i32, %arg1: i32) -> (i32, i32, i32, i32) {
    %c0_i32 = arith.constant 0 : i32
    %c0_i32_0 = arith.constant 0 : i32
    %c0_i32_1 = arith.constant 0 : i32
    %c0_i32_2 = arith.constant 0 : i32
    %c0_i32_3 = arith.constant 0 : i32
    return %c0_i32, %c0_i32_0, %c0_i32_1, %c0_i32_2 : i32, i32, i32, i32
  }
  func.func @transform_4(%arg0: i32, %arg1: i32) -> (i32, i32, i32, i32) {
    %c0_i32 = arith.constant 0 : i32
    %c0_i32_0 = arith.constant 0 : i32
    %c0_i32_1 = arith.constant 0 : i32
    return %arg0, %arg1, %c0_i32, %c0_i32_0 : i32, i32, i32, i32
  }
  func.func @transform_5(%arg0: i32, %arg1: i32) -> (i32, i32, i32, i32) {
    %c0_i32 = arith.constant 0 : i32
    %c0_i32_0 = arith.constant 0 : i32
    %c0_i32_1 = arith.constant 0 : i32
    return %arg0, %arg1, %c0_i32, %c0_i32_0 : i32, i32, i32, i32
  }
}

module attributes {stable_mosaic.version = 11 : i64} {
  func.func @kernel(%arg0: i32, %arg1: i32, %arg2: memref<1x1x2x8x8xbf16, #tpu.memory_space<vmem>>, %arg3: memref<1x1x8x128xbf16, #tpu.memory_space<vmem>>, %arg4: memref<1x1x8x128xf32, #tpu.memory_space<vmem>>, %arg5: memref<1x1x2x128xf32, #tpu.memory_space<vmem>>) attributes {dimension_semantics = [#tpu.dimension_semantics<parallel>, #tpu.dimension_semantics<parallel>], iteration_bounds = array<i64: 2, 8>, scalar_prefetch = 0 : i64, scratch_operands = 0 : i64, tpu.core_type = #tpu.core_type<tc>, window_params = [{transform_indices = @transform_0, window_bounds = array<i64: 1, 1, 2, 8, 8>}, {pipeline_mode = #tpu.pipeline_mode<synchronous>, transform_indices = @transform_1, window_bounds = array<i64: 1, 1, 8, 128>}, {transform_indices = @transform_2, window_bounds = array<i64: 1, 1, 8, 128>}, {transform_indices = @transform_3, window_bounds = array<i64: 1, 1, 2, 128>}]} {
    %c0 = arith.constant 0 : index
    %c0_0 = arith.constant 0 : index
    %c0_1 = arith.constant 0 : index
    %c0_2 = arith.constant 0 : index
    %c0_3 = arith.constant 0 : index
    %0 = vector.load %arg2[%c0, %c0_0, %c0_1, %c0_2, %c0_3] : memref<1x1x2x8x8xbf16, #tpu.memory_space<vmem>>, vector<1x1x1x8x8xbf16>
    %1 = vector.shape_cast %0 : vector<1x1x1x8x8xbf16> to vector<8x8xbf16>
    %c0_4 = arith.constant 0 : index
    %c0_5 = arith.constant 0 : index
    %c0_6 = arith.constant 0 : index
    %c0_7 = arith.constant 0 : index
    %2 = vector.load %arg3[%c0_4, %c0_5, %c0_6, %c0_7] : memref<1x1x8x128xbf16, #tpu.memory_space<vmem>>, vector<1x1x8x128xbf16>
    %3 = vector.shape_cast %2 : vector<1x1x8x128xbf16> to vector<8x128xbf16>
    %cst = arith.constant dense<0.000000e+00> : vector<8x128xf32>
    %4 = tpu.matmul %1, %3, %cst {dimension_numbers = #tpu.dot_dimension_numbers<[1], [0], [0], [1], [0, 0, 1, 1], [], []>} : vector<8x8xbf16>, vector<8x128xbf16>, vector<8x128xf32> -> vector<8x128xf32>
    %c0_8 = arith.constant 0 : index
    %c0_9 = arith.constant 0 : index
    %c0_10 = arith.constant 0 : index
    %c0_11 = arith.constant 0 : index
    %5 = vector.load %arg4[%c0_8, %c0_9, %c0_10, %c0_11] : memref<1x1x8x128xf32, #tpu.memory_space<vmem>>, vector<1x1x8x128xf32>
    %6 = vector.shape_cast %5 : vector<1x1x8x128xf32> to vector<8x128xf32>
    %7 = vector.shape_cast %4 : vector<8x128xf32> to vector<1x1x8x128xf32>
    tpu.vector_store %arg4[%c0_8, %c0_9, %c0_10, %c0_11], %7 {strides = array<i32>} : memref<1x1x8x128xf32, #tpu.memory_space<vmem>>, vector<1x1x8x128xf32>,
    %cst_12 = arith.constant dense<0.000000e+00> : vector<128xf32>
    %8 = vector.multi_reduction <add>, %4, %cst_12 [0] : vector<8x128xf32> to vector<128xf32>
    %9 = vector.shape_cast %8 : vector<128xf32> to vector<1x128xf32>
    %c0_13 = arith.constant 0 : index
    %c0_14 = arith.constant 0 : index
    %c0_15 = arith.constant 0 : index
    %c0_16 = arith.constant 0 : index
    %10 = vector.load %arg5[%c0_13, %c0_14, %c0_15, %c0_16] : memref<1x1x2x128xf32, #tpu.memory_space<vmem>>, vector<1x1x1x128xf32>
    %11 = vector.shape_cast %10 : vector<1x1x1x128xf32> to vector<1x128xf32>
    %12 = vector.shape_cast %9 : vector<1x128xf32> to vector<1x1x1x128xf32>
    tpu.vector_store %arg5[%c0_13, %c0_14, %c0_15, %c0_16], %12 {strides = array<i32>} : memref<1x1x2x128xf32, #tpu.memory_space<vmem>>, vector<1x1x1x128xf32>,
    %13 = arith.mulf %4, %4 : vector<8x128xf32>
    %cst_17 = arith.constant dense<0.000000e+00> : vector<128xf32>
    %14 = vector.multi_reduction <add>, %13, %cst_17 [0] : vector<8x128xf32> to vector<128xf32>
    %15 = vector.shape_cast %14 : vector<128xf32> to vector<1x128xf32>
    %c0_18 = arith.constant 0 : index
    %c0_19 = arith.constant 0 : index
    %c1 = arith.constant 1 : index
    %c0_20 = arith.constant 0 : index
    %16 = vector.load %arg5[%c0_18, %c0_19, %c1, %c0_20] : memref<1x1x2x128xf32, #tpu.memory_space<vmem>>, vector<1x1x1x128xf32>
    %17 = vector.shape_cast %16 : vector<1x1x1x128xf32> to vector<1x128xf32>
    %18 = vector.shape_cast %15 : vector<1x128xf32> to vector<1x1x1x128xf32>
    tpu.vector_store %arg5[%c0_18, %c0_19, %c1, %c0_20], %18 {strides = array<i32>} : memref<1x1x2x128xf32, #tpu.memory_space<vmem>>, vector<1x1x1x128xf32>,
    return
  }
  func.func @transform_0(%arg0: i32, %arg1: i32) -> (i32, i32, i32, i32, i32) {
    %c2_i32 = arith.constant 2 : i32
    %0 = arith.muli %arg1, %c2_i32 : i32
    %c0_i32 = arith.constant 0 : i32
    %1 = arith.addi %0, %c0_i32 : i32
    %c0_i32_0 = arith.constant 0 : i32
    %c0_i32_1 = arith.constant 0 : i32
    %c0_i32_2 = arith.constant 0 : i32
    %c0_i32_3 = arith.constant 0 : i32
    return %arg0, %1, %c0_i32_0, %c0_i32_1, %c0_i32_2 : i32, i32, i32, i32, i32
  }
  func.func @transform_1(%arg0: i32, %arg1: i32) -> (i32, i32, i32, i32) {
    %c0_i32 = arith.constant 0 : i32
    %c0_i32_0 = arith.constant 0 : i32
    %c0_i32_1 = arith.constant 0 : i32
    %c0_i32_2 = arith.constant 0 : i32
    %c0_i32_3 = arith.constant 0 : i32
    return %c0_i32, %c0_i32_0, %c0_i32_1, %c0_i32_2 : i32, i32, i32, i32
  }
  func.func @transform_2(%arg0: i32, %arg1: i32) -> (i32, i32, i32, i32) {
    %c0_i32 = arith.constant 0 : i32
    %c0_i32_0 = arith.constant 0 : i32
    %c0_i32_1 = arith.constant 0 : i32
    return %arg0, %arg1, %c0_i32, %c0_i32_0 : i32, i32, i32, i32
  }
  func.func @transform_3(%arg0: i32, %arg1: i32) -> (i32, i32, i32, i32) {
    %c0_i32 = arith.constant 0 : i32
    %c0_i32_0 = arith.constant 0 : i32
    %c0_i32_1 = arith.constant 0 : i32
    return %arg0, %arg1, %c0_i32, %c0_i32_0 : i32, i32, i32, i32
  }
}

module attributes {stable_mosaic.version = 11 : i64} {
  func.func @kernel(%arg0: i32, %arg1: memref<128x128xf32, #tpu.memory_space<vmem>>, %arg2: memref<1x128xf32, #tpu.memory_space<vmem>>, %arg3: memref<1x128xf32, #tpu.memory_space<vmem>>, %arg4: memref<128x128xf32, #tpu.memory_space<vmem>>, %arg5: memref<1x128xf32, #tpu.memory_space<vmem>>, %arg6: memref<1x128xf32, #tpu.memory_space<vmem>>, %arg7: memref<128x128xf32, #tpu.memory_space<vmem>>) attributes {dimension_semantics = [#tpu.dimension_semantics<parallel>], iteration_bounds = array<i64: 1>, scalar_prefetch = 0 : i64, scratch_operands = 0 : i64, tpu.core_type = #tpu.core_type<tc>, window_params = [{transform_indices = @transform_0, window_bounds = array<i64: 128, 128>}, {pipeline_mode = #tpu.pipeline_mode<synchronous>, transform_indices = @transform_1, window_bounds = array<i64: 1, 128>}, {pipeline_mode = #tpu.pipeline_mode<synchronous>, transform_indices = @transform_2, window_bounds = array<i64: 1, 128>}, {transform_indices = @transform_3, window_bounds = array<i64: 128, 128>}, {pipeline_mode = #tpu.pipeline_mode<synchronous>, transform_indices = @transform_4, window_bounds = array<i64: 1, 128>}, {pipeline_mode = #tpu.pipeline_mode<synchronous>, transform_indices = @transform_5, window_bounds = array<i64: 1, 128>}, {transform_indices = @transform_6, window_bounds = array<i64: 128, 128>}]} {
    %c0 = arith.constant 0 : index
    %c0_0 = arith.constant 0 : index
    %0 = vector.load %arg1[%c0, %c0_0] : memref<128x128xf32, #tpu.memory_space<vmem>>, vector<128x128xf32>
    %c0_1 = arith.constant 0 : index
    %c0_2 = arith.constant 0 : index
    %1 = vector.load %arg2[%c0_1, %c0_2] : memref<1x128xf32, #tpu.memory_space<vmem>>, vector<1x128xf32>
    %2 = vector.broadcast %1 : vector<1x128xf32> to vector<128x128xf32>
    %3 = arith.mulf %0, %2 : vector<128x128xf32>
    %c0_3 = arith.constant 0 : index
    %c0_4 = arith.constant 0 : index
    %4 = vector.load %arg3[%c0_3, %c0_4] : memref<1x128xf32, #tpu.memory_space<vmem>>, vector<1x128xf32>
    %5 = vector.broadcast %4 : vector<1x128xf32> to vector<128x128xf32>
    %6 = arith.addf %3, %5 : vector<128x128xf32>
    %c0_5 = arith.constant 0 : index
    %c0_6 = arith.constant 0 : index
    %7 = vector.load %arg4[%c0_5, %c0_6] : memref<128x128xf32, #tpu.memory_space<vmem>>, vector<128x128xf32>
    %c0_7 = arith.constant 0 : index
    %c0_8 = arith.constant 0 : index
    %8 = vector.load %arg5[%c0_7, %c0_8] : memref<1x128xf32, #tpu.memory_space<vmem>>, vector<1x128xf32>
    %9 = vector.broadcast %8 : vector<1x128xf32> to vector<128x128xf32>
    %10 = arith.mulf %7, %9 : vector<128x128xf32>
    %c0_9 = arith.constant 0 : index
    %c0_10 = arith.constant 0 : index
    %11 = vector.load %arg6[%c0_9, %c0_10] : memref<1x128xf32, #tpu.memory_space<vmem>>, vector<1x128xf32>
    %12 = vector.broadcast %11 : vector<1x128xf32> to vector<128x128xf32>
    %13 = arith.addf %10, %12 : vector<128x128xf32>
    %14 = arith.addf %6, %13 : vector<128x128xf32>
    %cst = arith.constant 0.000000e+00 : f32
    %15 = vector.broadcast %cst : f32 to vector<128x128xf32>
    %16 = arith.maximumf %14, %15 : vector<128x128xf32>
    %c0_11 = arith.constant 0 : index
    %c0_12 = arith.constant 0 : index
    %17 = vector.load %arg7[%c0_11, %c0_12] : memref<128x128xf32, #tpu.memory_space<vmem>>, vector<128x128xf32>
    tpu.vector_store %arg7[%c0_11, %c0_12], %16 {strides = array<i32>} : memref<128x128xf32, #tpu.memory_space<vmem>>, vector<128x128xf32>,
    return
  }
  func.func @transform_0(%arg0: i32) -> (i32, i32) {
    %c0_i32 = arith.constant 0 : i32
    %c0_i32_0 = arith.constant 0 : i32
    return %arg0, %c0_i32 : i32, i32
  }
  func.func @transform_1(%arg0: i32) -> (i32, i32) {
    %c0_i32 = arith.constant 0 : i32
    %c0_i32_0 = arith.constant 0 : i32
    %c0_i32_1 = arith.constant 0 : i32
    return %c0_i32, %c0_i32_0 : i32, i32
  }
  func.func @transform_2(%arg0: i32) -> (i32, i32) {
    %c0_i32 = arith.constant 0 : i32
    %c0_i32_0 = arith.constant 0 : i32
    %c0_i32_1 = arith.constant 0 : i32
    return %c0_i32, %c0_i32_0 : i32, i32
  }
  func.func @transform_3(%arg0: i32) -> (i32, i32) {
    %c0_i32 = arith.constant 0 : i32
    %c0_i32_0 = arith.constant 0 : i32
    return %arg0, %c0_i32 : i32, i32
  }
  func.func @transform_4(%arg0: i32) -> (i32, i32) {
    %c0_i32 = arith.constant 0 : i32
    %c0_i32_0 = arith.constant 0 : i32
    %c0_i32_1 = arith.constant 0 : i32
    return %c0_i32, %c0_i32_0 : i32, i32
  }
  func.func @transform_5(%arg0: i32) -> (i32, i32) {
    %c0_i32 = arith.constant 0 : i32
    %c0_i32_0 = arith.constant 0 : i32
    %c0_i32_1 = arith.constant 0 : i32
    return %c0_i32, %c0_i32_0 : i32, i32
  }
  func.func @transform_6(%arg0: i32) -> (i32, i32) {
    %c0_i32 = arith.constant 0 : i32
    %c0_i32_0 = arith.constant 0 : i32
    return %arg0, %c0_i32 : i32, i32
  }
}

</mosaic_0001>

<bundles_post_ra>
// kernel: _lambda_.6
= control target key start
LH: loop header
LB: loop body
LE: loop exit
PB: predicated region body
PF: predicated region fallthrough
CT: control target
= control target key end

     0   :  { %s391_s0 = inlined_call_operand.vmem [shape: f32[128,128], index: 0, kind: input, shape index: {}]   ;;  %s392_s1 = inlined_call_operand.vmem [shape: f32[1,128], index: 1, kind: input, shape index: {}]   ;;  %s393_s2 = inlined_call_operand.vmem [shape: f32[1,128], index: 2, kind: input, shape index: {}]   ;;  %s394_s3 = inlined_call_operand.vmem [shape: bf16[128,128], index: 3, kind: output, shape index: {}]  }
   0x1   :  { %v14_v0 = vld [vmem:[%s391_s0] sm:$0xff]  ;;  %v15_v1 = vld [vmem:[%s391_s0 + $0x8] sm:$0xff]  ;;  %v16_v6 = vld [vmem:[%s391_s0 + $0x10] sm:$0xff] }
   0x2   :  { %v286_v2 = vld [vmem:[%s392_s1] ss:$0 sm:$0xff]  ;;  %v17_v7 = vld [vmem:[%s391_s0 + $0x18] sm:$0xff]  ;;  %v19_v11 = vld [vmem:[%s391_s0 + $0x28] sm:$0xff] }
   0x3   :  { %v37_v3 = vmul.f32 %v286_v2, %v14_v0  ;;  %v38_v4 = vmul.f32 %v286_v2, %v15_v1  ;;  %v293_v5 = vld [vmem:[%s393_s2] ss:$0 sm:$0xff]  ;;  %v39_v8 = vmul.f32 %v286_v2, %v16_v6  ;;  %v40_v9 = vmul.f32 %v286_v2, %v17_v7  ;;  %v20_v12 = vld [vmem:[%s391_s0 + $0x30] sm:$0xff]  ;;  %v21_v17 = vld [vmem:[%s391_s0 + $0x38] sm:$0xff] }
   0x4   :  { %v18_v10 = vld [vmem:[%s391_s0 + $0x20] sm:$0xff]  ;;  %v42_v16 = vmul.f32 %v286_v2, %v19_v11  ;;  %v43_v20 = vmul.f32 %v286_v2, %v20_v12  ;;  %v44_v21 = vmul.f32 %v286_v2, %v21_v17  ;;  %v23_v27 = vld [vmem:[%s391_s0 + $0x48] sm:$0xff]  ;;  %v24_v32 = vld [vmem:[%s391_s0 + $0x50] sm:$0xff] }
   0x5   :  { %v60_v13 = vadd.f32 %v293_v5, %v37_v3  ;;  %v61_v14 = vadd.f32 %v293_v5, %v38_v4  ;;  %v41_v15 = vmul.f32 %v286_v2, %v18_v10  ;;  %v62_v18 = vadd.f32 %v293_v5, %v39_v8  ;;  %v22_v22 = vld [vmem:[%s391_s0 + $0x40] sm:$0xff]  ;;  %v25_v33 = vld [vmem:[%s391_s0 + $0x58] sm:$0xff]  ;;  %v27_v39 = vld [vmem:[%s391_s0 + $0x68] sm:$0xff] }
   0x6   :  { %v63_v19 = vadd.f32 %v293_v5, %v40_v9  ;;  %v65_v26 = vadd.f32 %v293_v5, %v42_v16  ;;  %v66_v30 = vadd.f32 %v293_v5, %v43_v20  ;;  %v67_v31 = vadd.f32 %v293_v5, %v44_v21  ;;  %v26_v38 = vld [vmem:[%s391_s0 + $0x60] sm:$0xff]  ;;  %v28_v44 = vld [vmem:[%s391_s0 + $0x70] sm:$0xff]  ;;  %v29_v49 = vld [vmem:[%s391_s0 + $0x78] sm:$0xff] }
   0x7   :  { %v76_v23 = vmax.f32 %v60_v13, 0.0  ;;  %v77_v24 = vmax.f32 %v61_v14, 0.0  ;;  %v64_v25 = vadd.f32 %v293_v5, %v41_v15  ;;  %v78_v28 = vmax.f32 %v62_v18, 0.0 }
   0x8   :  { %v79_v29 = vmax.f32 %v63_v19, 0.0  ;;  %v81_v36 = vmax.f32 %v65_v26, 0.0  ;;  %v45_v37 = vmul.f32 %v286_v2, %v22_v22  ;;  %v82_v41 = vmax.f32 %v66_v30, 0.0 }
   0x9   :  { %v213_v34 = vpack.c.bf16 %v77_v24, %v76_v23  ;;  %v80_v35 = vmax.f32 %v64_v25, 0.0  ;;  %v83_v42 = vmax.f32 %v67_v31, 0.0  ;;  %v46_v43 = vmul.f32 %v286_v2, %v23_v27 }
   0xa   :  { %v218_v40 = vpack.c.bf16 %v79_v29, %v78_v28  ;;  %v68_v46 = vadd.f32 %v293_v5, %v45_v37  ;;  %v47_v47 = vmul.f32 %v286_v2, %v24_v32  ;;  %v48_v48 = vmul.f32 %v286_v2, %v25_v33 }
   0xb   :  { %214 = vst [vmem:[%s394_s3] sm:$0xff] %v213_v34   ;;  %v223_v45 = vpack.c.bf16 %v81_v36, %v80_v35  ;;  %v228_v50 = vpack.c.bf16 %v83_v42, %v82_v41  ;;  %v69_v51 = vadd.f32 %v293_v5, %v46_v43  ;;  %v49_v52 = vmul.f32 %v286_v2, %v26_v38 }
   0xc   :  { %250 = vst [vmem:[%s394_s3 + $0x8] sm:$0xff] %v218_v40   ;;  %v50_v53 = vmul.f32 %v286_v2, %v27_v39  ;;  %v84_v54 = vmax.f32 %v68_v46, 0.0  ;;  %v70_v55 = vadd.f32 %v293_v5, %v47_v47  ;;  %v71_v56 = vadd.f32 %v293_v5, %v48_v48 }
   0xd   :  { %251 = vst [vmem:[%s394_s3 + $0x10] sm:$0xff] %v223_v45   ;;  %v51_v57 = vmul.f32 %v286_v2, %v28_v44  ;;  %252 = vst [vmem:[%s394_s3 + $0x18] sm:$0xff] %v228_v50   ;;  %v85_v58 = vmax.f32 %v69_v51, 0.0  ;;  %v72_v59 = vadd.f32 %v293_v5, %v49_v52  ;;  %v52_v61 = vmul.f32 %v286_v2, %v29_v49 }
   0xe   :  { %v73_v60 = vadd.f32 %v293_v5, %v50_v53  ;;  %v86_v62 = vmax.f32 %v70_v55, 0.0  ;;  %v87_v63 = vmax.f32 %v71_v56, 0.0 }
   0xf   :  { %v74_v0 = vadd.f32 %v293_v5, %v51_v57  ;;  %v233_v1 = vpack.c.bf16 %v85_v58, %v84_v54  ;;  %v88_v3 = vmax.f32 %v72_v59, 0.0  ;;  %v75_v6 = vadd.f32 %v293_v5, %v52_v61 }
  0x10   :  { %v89_v4 = vmax.f32 %v73_v60, 0.0  ;;  %v238_v7 = vpack.c.bf16 %v87_v63, %v86_v62 }
  0x11   :  { %v90_v8 = vmax.f32 %v74_v0, 0.0  ;;  %253 = vst [vmem:[%s394_s3 + $0x20] sm:$0xff] %v233_v1   ;;  %v91_v10 = vmax.f32 %v75_v6, 0.0 }
  0x12   :  { %v243_v9 = vpack.c.bf16 %v89_v4, %v88_v3  ;;  %254 = vst [vmem:[%s394_s3 + $0x28] sm:$0xff] %v238_v7  }
  0x13   :  { %v248_v2 = vpack.c.bf16 %v91_v10, %v90_v8 }
  0x14   :  { %255 = vst [vmem:[%s394_s3 + $0x30] sm:$0xff] %v243_v9  }
  0x15   :  { %256 = vst [vmem:[%s394_s3 + $0x38] sm:$0xff] %v248_v2  }

// kernel: _lambda_.5
= control target key start
LH: loop header
LB: loop body
LE: loop exit
PB: predicated region body
PF: predicated region fallthrough
CT: control target
= control target key end

     0   :  { %s1308_s18 = smov 0   ;;  %s1310_s19 = smov 0   ;;  %s1464_s0 = inlined_call_operand.vmem [shape: bf16[2,18,2,9,8], index: 0, kind: input, shape index: {}, may-alias: {0,1,2}]   ;;  %s1465_s1 = inlined_call_operand.vmem [shape: bf16[2,18,2,9,8], index: 1, kind: input, shape index: {}, may-alias: {0,1,2}]   ;;  %s1466_s2 = inlined_call_operand.vmem [shape: bf16[2,18,2,9,8], index: 2, kind: input, shape index: {}, may-alias: {0,1,2}]   ;;  %s1467_s3 = inlined_call_operand.vmem [shape: bf16[3,3,8,128], index: 3, kind: input, shape index: {}]   ;;  %s1468_s4 = inlined_call_operand.vmem [shape: f32[2,8,8,128], index: 4, kind: output, shape index: {0}]   ;;  %s1469_s5 = inlined_call_operand.vmem [shape: f32[2,8,2,128], index: 5, kind: output, shape index: {1}]  }
   0x1   :  { %s1312_s20 = smov 0   ;;  %s1314_s21 = smov 0  }
   0x2   :  { %s1316_s22 = smov 0  }
   0x3 LB: > { %s25_s23 = sadd.s32 1, %s1266_s20  ;;  %s28_s24 = sadd.s32 1, %s1270_s21  ;;  %s1274_s22 = sphi %s1316_s22, %s16_s22   ;;  %s1270_s21 = sphi %s1314_s21, %s1473_s21   ;;  %s1266_s20 = sphi %s1312_s20, %s1472_s20   ;;  %s1262_s19 = sphi %s1310_s19, %s1471_s19   ;;  %s1258_s18 = sphi %s1308_s18, %s1470_s18  }
   0x4   : > { %p26_p0 = scmp.ge.s32.totalorder %s25_s23, 8  ;;  %p1079_p1 = scmp.ge.s32.totalorder %s1274_s22, 1 }
   0x5   : > { %p264_p2 = scmp.lt.s32.totalorder %s1274_s22, 17 }
   0x6   : > { %s1475_s23 = smov (%p26_p0, %s25_s23), 0  ;;  %s1477_s24 = smov (!%p26_p0, %s28_s24), %s1270_s21 }
   0x7   : > { %p265_p3 = pnand %p1079_p1, %p264_p2  ;;  %p30_p4 = scmp.ge.s32.totalorder %s1477_s24, 2 }
   0x8   : > { %s1353_s29 = sshll.u32 (!%p265_p3), %s1258_s18, 1  ;;  %p331_p5 = scmp.lt.s32.totalorder (!%p265_p3), %s1262_s19, 1 }
   0x9   : > { %s1479_s24 = smov (%p30_p4, %s1477_s24), 0  ;;  %268 = sbr.rel (%p265_p3) target bundleno = 265 (0x109), region = 36 }
   0xa   : > { %p333_p6 = scmp.lt.s32.totalorder (!%p265_p3), %s1353_s29, 17  ;;  %s342_s30 = sadd.s32 (!%p265_p3), 1, %s1353_s29 }
   0xb   : > { %s355_s13 = sadd.s32 (!%p265_p3), 2, %s1353_s29  ;;  %p345_p7 = scmp.lt.s32.totalorder (!%p265_p3), %s342_s30, 17 }
   0xc   : > { %p358_p8 = scmp.lt.s32.totalorder (!%p265_p3), %s355_s13, 17  ;;  %p369_p9 = scmp.lt.s32.totalorder (!%p265_p3), %s1258_s18, 7 }
   0xe   : > { %v1094_v0 = vld [vmem:[%s1467_s3 + $0x4] sm:$0xf]  ;;  %vm394_vm0 = vcmask 1043456   ;;  %v385_v1 = vld [vmem:[%s1467_s3] sm:$0xf]  ;;  %v1276_v2 = vmov 0.0  }
   0xf   : > { %1136 = vmatprep.subr.bf16.mxu0 %v1276_v2  ;;  %v396_v3 = vsel %vm394_vm0, %v1094_v0, 0  ;;  %1142 = vmatprep.subr.bf16.mxu1 %v1276_v2  ;;  %v442_v4 = vsel %vm394_vm0, %v385_v1, 0  ;;  %vm1277_vm1 = vmmov 0   ;;  %s1481_s19 = smov (!%p331_p5, %s1262_s19), 1  ;;  %v1097_v5 = vld [vmem:[%s1467_s3 + $0x8] sm:$0xf] }
  0x10   : > { %1137 = vmatpush3.bf16.msra.mxu0 %v396_v3  ;;  %1143 = vmatpush3.bf16.msra.mxu1 %v442_v4  ;;  %s334_s6 = scalar_select %p333_p6, %s1353_s29, 17  ;;  %v1100_v6 = vld [vmem:[%s1467_s3 + $0xc] sm:$0xf]  ;;  %vm390_vm2 = vcmask 64512   ;;  %v504_v7 = vsel %vm394_vm0, %v1097_v5, 0 }
  0x11   : > { %1138 = vmatprep.mubr.msk.bf16.mxu0 %vm1277_vm1, %v1276_v2  ;;  %1144 = vmatprep.mubr.msk.bf16.mxu1 %vm1277_vm1, %v1276_v2  ;;  %s1369_s7 = smul.u32 72, %s1481_s19  ;;  %v554_v8 = vsel %vm394_vm0, %v1100_v6, 0  ;;  %s1483_s30 = smov (!%p345_p7, %s342_s30), 17  ;;  %v1103_v14 = vld [vmem:[%s1467_s3 + $0x10] sm:$0xf] }
  0x12   : > { %1148 = vmatprep.subr.bf16.mxu0 %v1276_v2  ;;  %1154 = vmatprep.subr.bf16.mxu1 %v1276_v2  ;;  %s1081_s8 = sshll.u32 %s334_s6, 2  ;;  %s1485_s13 = smov (!%p358_p8, %s355_s13), 17  ;;  %v1105_v16 = vld [vmem:[%s1467_s3 + $0x14] sm:$0xf]  ;;  %v605_v17 = vsel %vm394_vm0, %v1103_v14, 0 }
  0x13   : > { %s337_s14 = sadd.s32 %s1369_s7, %s1081_s8  ;;  %s1084_s26 = sshll.u32 %s1483_s30, 2  ;;  %v668_v21 = vsel %vm394_vm0, %v1105_v16, 0  ;;  %v1108_v25 = vld [vmem:[%s1467_s3 + $0x18] sm:$0xf]  ;;  %v1111_v26 = vld [vmem:[%s1467_s3 + $0x1c] sm:$0xf] }
  0x14   : > { %s1082_s15 = sshll.u32 %s337_s14, 2  ;;  %s349_s29 = sadd.s32 %s1369_s7, %s1084_s26  ;;  %v718_v29 = vsel %vm394_vm0, %v1108_v25, 0  ;;  %v769_v30 = vsel %vm394_vm0, %v1111_v26, 0  ;;  %v1113_v32 = vld [vmem:[%s1467_s3 + $0x20] sm:$0xf] }
  0x15   : > { %s339_s25 = scalar_lea.vmem %s1464_s0, %s1082_s15  ;;  %s1087_s6 = sshll.u32 %s1485_s13, 2  ;;  %v832_v36 = vsel %vm394_vm0, %v1113_v32, 0 }
  0x16   : > { %v1093_v9 = vld [vmem:[%s339_s25 + $0x8] sm:$0xf]  ;;  %v1233_v10 = vld [vmem:[%s339_s25] sm:$0x1f]   ;;  %s1085_s8 = sshll.u32 %s349_s29, 2  ;;  %s362_s30 = sadd.s32 %s1369_s7, %s1087_s6 }
  0x17   : > { %1139 = vmatmul.mubr.msk.bf16.vlgmr.msra.gmra.mxu0 %vm390_vm2, %v1093_v9  ;;  %v384_v11 = vld [vmem:[%s339_s25] sm:$0xf]  ;;  %v494_v12 = vshrl.u32 %v1233_v10, 16  ;;  %v496_v13 = vshll.u32 %v1233_v10, 16  ;;  %s351_s14 = scalar_lea.vmem %s1465_s1, %s1085_s8  ;;  %s1088_s15 = sshll.u32 %s362_s30, 2 }
  0x18   : > { %1145 = vmatmul.mubr.msk.bf16.vlgmr.msra.gmra.mxu1 %vm390_vm2, %v384_v11  ;;  %1149 = vmatpush3.bf16.msra.mxu0 %v504_v7  ;;  %v547_v19 = vld [vmem:[%s351_s14] sm:$0xf]  ;;  %s364_s17 = scalar_lea.vmem %s1466_s2, %s1088_s15  ;;  %v1102_v27 = vld [vmem:[%s351_s14 + $0x8] sm:$0xf]  ;;  %s1487_s18 = smov (!%p369_p9, %s1258_s18), 7 }
  0x19   : > { %1155 = vmatpush3.bf16.msra.mxu1 %v554_v8  ;;  %1150 = vmatprep.mubr.msk.bf16.mxu0 %vm1277_vm1, %v1276_v2  ;;  %v498_v15 = vrot.slane %v496_v13, 1  ;;  %v1234_v20 = vld [vmem:[%s351_s14] sm:$0x1f]   ;;  %v1110_v35 = vld [vmem:[%s364_s17 + $0x8] sm:$0xf]  ;;  %s1089_s6 = sshll.u32 %s1481_s19, 3 }
  0x1a   : > { %1156 = vmatprep.mubr.msk.bf16.mxu1 %vm1277_vm1, %v1276_v2  ;;  %1160 = vmatprep.subr.bf16.mxu0 %v1276_v2  ;;  %v658_v22 = vshrl.u32 %v1234_v20, 16  ;;  %v660_v23 = vshll.u32 %v1234_v20, 16  ;;  %v1235_v31 = vld [vmem:[%s364_s17] sm:$0x1f]   ;;  %s372_s8 = sadd.s32 %s1089_s6, %s1487_s18 }
  0x1b   : > { %1166 = vmatprep.subr.bf16.mxu1 %v1276_v2  ;;  %v499_v18 = vor.u32 %v498_v15, %v494_v12  ;;  %v824_v33 = vshll.u32 %v1235_v31, 16  ;;  %v711_v34 = vld [vmem:[%s364_s17] sm:$0xf]  ;;  %v822_v37 = vshrl.u32 %v1235_v31, 16  ;;  %s1090_s9 = sshll.u32 %s372_s8, 3  ;;  %s1092_s18 = sshll.u32 %s372_s8, 1 }
  0x1c   : > { %v662_v24 = vrot.slane %v660_v23, 1  ;;  %s374_s11 = scalar_lea.vmem %s1468_s4, %s1090_s9  ;;  %s382_s14 = scalar_lea.vmem %s1469_s5, %s1092_s18 }
  0x1d   : > { %v826_v38 = vrot.slane %v824_v33, 1 }
  0x1e   : > { %v663_v28 = vor.u32 %v662_v24, %v658_v22 }
  0x1f   : > { %1151 = vmatmul.mubr.msk.bf16.vlgmr.msra.gmra.mxu0 %vm390_vm2, %v499_v18  ;;  %v827_v39 = vor.u32 %v826_v38, %v822_v37 }
  0x20   : > { %1157 = vmatmul.mubr.msk.bf16.vlgmr.msra.gmra.mxu1 %vm390_vm2, %v547_v19  ;;  %1161 = vmatpush3.bf16.msra.mxu0 %v605_v17 }
  0x21   : > { %1167 = vmatpush3.bf16.msra.mxu1 %v668_v21  ;;  %1162 = vmatprep.mubr.msk.bf16.mxu0 %vm1277_vm1, %v1276_v2 }
  0x22   : > { %1168 = vmatprep.mubr.msk.bf16.mxu1 %vm1277_vm1, %v1276_v2  ;;  %1172 = vmatprep.subr.bf16.mxu0 %v1276_v2 }
  0x23   : > { %1178 = vmatprep.subr.bf16.mxu1 %v1276_v2 }
  0x27   : > { %1163 = vmatmul.mubr.msk.bf16.vlgmr.msra.gmra.mxu0 %vm390_vm2, %v1102_v27 }
  0x28   : > { %1169 = vmatmul.mubr.msk.bf16.vlgmr.msra.gmra.mxu1 %vm390_vm2, %v663_v28  ;;  %1173 = vmatpush3.bf16.msra.mxu0 %v718_v29 }
  0x29   : > { %1179 = vmatpush3.bf16.msra.mxu1 %v769_v30  ;;  %1174 = vmatprep.mubr.msk.bf16.mxu0 %vm1277_vm1, %v1276_v2 }
  0x2a   : > { %1180 = vmatprep.mubr.msk.bf16.mxu1 %vm1277_vm1, %v1276_v2  ;;  %1184 = vmatprep.subr.bf16.mxu0 %v1276_v2 }
  0x2f   : > { %1175 = vmatmul.mubr.msk.bf16.vlgmr.msra.gmra.mxu0 %vm390_vm2, %v711_v34 }
  0x30   : > { %1181 = vmatmul.mubr.msk.bf16.vlgmr.msra.gmra.mxu1 %vm390_vm2, %v1110_v35  ;;  %1185 = vmatpush3.bf16.msra.mxu0 %v832_v36 }
  0x31   : > { %1186 = vmatprep.mubr.msk.bf16.mxu0 %vm1277_vm1, %v1276_v2 }
  0x37   : > { %1187 = vmatmul.mubr.msk.bf16.vlgmr.msra.gmra.mxu0 %vm390_vm2, %v827_v39 }
  0xd7   : > { %v432_v40 = vpop.f32.mrf.mxu0 }
  0xd8   : > { %v478_v41 = vpop.f32.mrf.mxu1 }
  0xd9   : > { %v1140_v42 = vpop.f32.mrf.mxu0  ;;  %v479_v53 = vadd.f32 %v478_v41, %v432_v40 }
  0xda   : > { %v1146_v43 = vpop.f32.mrf.mxu1 }
  0xdb   : > { %v435_v44 = vpop.f32.mrf.mxu0 }
  0xdc   : > { %v481_v45 = vpop.f32.mrf.mxu1 }
  0xdd   : > { %v1141_v46 = vpop.f32.mrf.mxu0 }
  0xde   : > { %v1147_v47 = vpop.f32.mrf.mxu1 }
  0xdf   : > { %v540_v48 = vpop.f32.mrf.mxu0 }
  0xe0   : > { %v590_v49 = vpop.f32.mrf.mxu1  ;;  %v546_v56 = vadd.f32 %v540_v48, %v479_v53 }
  0xe1   : > { %v1152_v50 = vpop.f32.mrf.mxu0 }
  0xe2   : > { %v1158_v51 = vpop.f32.mrf.mxu1  ;;  %v596_v61 = vadd.f32 %v590_v49, %v546_v56 }
  0xe3   : > { %v543_v52 = vpop.f32.mrf.mxu0 }
  0xe4   : > { %v593_v54 = vpop.f32.mrf.mxu1 }
  0xe5   : > { %v1153_v55 = vpop.f32.mrf.mxu0 }
  0xe6   : > { %v1159_v57 = vpop.f32.mrf.mxu1 }
  0xe7   : > { %v641_v58 = vpop.f32.mrf.mxu0 }
  0xe8   : > { %v704_v59 = vpop.f32.mrf.mxu1  ;;  %v647_v0 = vadd.f32 %v641_v58, %v596_v61 }
  0xe9   : > { %v1164_v60 = vpop.f32.mrf.mxu0 }
  0xea   : > { %v1170_v62 = vpop.f32.mrf.mxu1  ;;  %v710_v5 = vadd.f32 %v704_v59, %v647_v0 }
  0xeb   : > { %v644_v63 = vpop.f32.mrf.mxu0 }
  0xec   : > { %v707_v1 = vpop.f32.mrf.mxu1 }
  0xed   : > { %v1165_v2 = vpop.f32.mrf.mxu0 }
  0xee   : > { %v1171_v3 = vpop.f32.mrf.mxu1 }
  0xef   : > { %v754_v4 = vpop.f32.mrf.mxu0 }
  0xf0   : > { %v805_v6 = vpop.f32.mrf.mxu1  ;;  %v760_v8 = vadd.f32 %v754_v4, %v710_v5 }
  0xf1   : > { %v1176_v7 = vpop.f32.mrf.mxu0 }
  0xf2   : > { %v1182_v9 = vpop.f32.mrf.mxu1  ;;  %v811_v13 = vadd.f32 %v805_v6, %v760_v8 }
  0xf3   : > { %v757_v10 = vpop.f32.mrf.mxu0 }
  0xf4   : > { %v808_v11 = vpop.f32.mrf.mxu1 }
  0xf5   : > { %v1177_v12 = vpop.f32.mrf.mxu0 }
  0xf6   : > { %v1183_v14 = vpop.f32.mrf.mxu1 }
  0xf7   : > { %v868_v15 = vpop.f32.mrf.mxu0 }
  0xf8   : > { %v874_v16 = vadd.f32 %v868_v15, %v811_v13 }
  0xf9   : > { %v1188_v17 = vpop.f32.mrf.mxu0 }
  0xfa   : > { %875 = vst [vmem:[%s374_s11] sm:$0xff] %v874_v16  ;;  %v876_v18 = vrot.slane %v874_v16, 4  ;;  %v883_v19 = vmul.f32 %v874_v16, %v874_v16 }
  0xfb   : > { %v871_v20 = vpop.f32.mrf.mxu0 }
  0xfc   : > { %v877_v21 = vadd.f32 %v876_v18, %v874_v16  ;;  %v884_v22 = vrot.slane %v883_v19, 4 }
  0xfd   : > { %v1189_v23 = vpop.f32.mrf.mxu0 }
  0xfe   : > { %v878_v24 = vrot.slane %v877_v21, 2  ;;  %v885_v25 = vadd.f32 %v884_v22, %v883_v19 }
 0x100   : > { %v879_v26 = vadd.f32 %v878_v24, %v877_v21  ;;  %v886_v27 = vrot.slane %v885_v25, 2 }
 0x102   : > { %v880_v28 = vrot.slane %v879_v26, 1  ;;  %v887_v29 = vadd.f32 %v886_v27, %v885_v25 }
 0x104   : > { %v881_v30 = vadd.f32 %v880_v28, %v879_v26  ;;  %v888_v31 = vrot.slane %v887_v29, 1 }
 0x106   : > { %882 = vst [vmem:[%s382_s14] sm:$0x1] %v881_v30  ;;  %v889_v32 = vadd.f32 %v888_v31, %v887_v29 }
 0x108   : > { %890 = vst [vmem:[%s382_s14 + $0x1] sm:$0x1] %v889_v32 }
 0x109 PF: > { %s16_s22 = sadd.s32 1, %s1274_s22   ;;  %s1470_s18 = smov %s1266_s20 }
 0x10a   : > { %p13_p10 = scmp.ge.s32.totalorder %s16_s22, 18   ;;  %s1471_s19 = smov %s1270_s21 }
 0x10b   : > { %s1472_s20 = smov %s1475_s23  ;;  %s1473_s21 = smov %s1479_s24 }
 0x10c   :  { %15 = sbr.rel (!%p13_p10) target bundleno = 3 (0x3), region = 95 }

// kernel: _lambda_.8
= control target key start
LH: loop header
LB: loop body
LE: loop exit
PB: predicated region body
PF: predicated region fallthrough
CT: control target
= control target key end

     0   :  { %s566_s12 = smov 0   ;;  %s568_s13 = smov 0   ;;  %s628_s0 = inlined_call_operand.vmem [shape: bf16[2,16,2,8,8], index: 0, kind: input, shape index: {}]   ;;  %s629_s1 = inlined_call_operand.vmem [shape: bf16[1,1,8,128], index: 1, kind: input, shape index: {}]   ;;  %s630_s2 = inlined_call_operand.vmem [shape: f32[2,8,8,128], index: 2, kind: output, shape index: {0}]   ;;  %s631_s3 = inlined_call_operand.vmem [shape: f32[2,8,2,128], index: 3, kind: output, shape index: {1}]  }
   0x1   :  { %s570_s14 = smov 0   ;;  %s572_s15 = smov 0  }
   0x2   :  { %s574_s16 = smov 0  }
   0x3 LB: > { %s23_s17 = sadd.s32 1, %s534_s14  ;;  %s26_s18 = sadd.s32 1, %s538_s15  ;;  %s542_s16 = sphi %s574_s16, %s14_s16   ;;  %s538_s15 = sphi %s572_s15, %s635_s15   ;;  %s534_s14 = sphi %s570_s14, %s634_s14   ;;  %s530_s13 = sphi %s568_s13, %s633_s13   ;;  %s526_s12 = sphi %s566_s12, %s632_s12  }
   0x4   : > { %p24_p0 = scmp.ge.s32.totalorder %s23_s17, 8  ;;  %p442_p1 = scmp.ge.s32.totalorder %s542_s16, 1 }
   0x5   : > { %p166_p2 = scmp.lt.s32.totalorder %s542_s16, 17 }
   0x6   : > { %s637_s17 = smov (%p24_p0, %s23_s17), 0  ;;  %s639_s18 = smov (!%p24_p0, %s26_s18), %s538_s15 }
   0x7   : > { %p167_p3 = pnand %p442_p1, %p166_p2  ;;  %p28_p4 = scmp.ge.s32.totalorder %s639_s18, 2 }
   0x8   : > { %s443_s21 = sshll.u32 (!%p167_p3), %s526_s12, 1  ;;  %p207_p5 = scmp.lt.s32.totalorder (!%p167_p3), %s530_s13, 1 }
   0x9   : > { %s641_s18 = smov (%p28_p4, %s639_s18), 0  ;;  %170 = sbr.rel (%p167_p3) target bundleno = 229 (0xe5), region = 28 }
   0xa   : > { %p209_p6 = scmp.lt.s32.totalorder (!%p167_p3), %s443_s21, 15  ;;  %p219_p7 = scmp.lt.s32.totalorder (!%p167_p3), %s526_s12, 7 }
   0xe   : > { %v235_v0 = vld [vmem:[%s629_s1] sm:$0xf]  ;;  %vm240_vm0 = vcmask 1043456   ;;  %v544_v1 = vmov 0.0   ;;  %vm545_vm1 = vmmov 0   ;;  %s643_s13 = smov (!%p207_p5, %s530_s13), 1 }
   0xf   : > { %456 = vmatprep.subr.bf16.mxu0 %v544_v1  ;;  %v242_v2 = vsel %vm240_vm0, %v235_v0, 0  ;;  %458 = vmatprep.mubr.msk.bf16.mxu0 %vm545_vm1, %v544_v1  ;;  %s645_s21 = smov (!%p209_p6, %s443_s21), 15  ;;  %s445_s22 = sshll.u32 %s643_s13, 5  ;;  %vm236_vm2 = vcmask 64512  }
  0x10   : > { %457 = vmatpush3.bf16.msra.mxu0 %v242_v2  ;;  %s444_s23 = sshll.u32 %s645_s21, 1  ;;  %s647_s12 = smov (!%p219_p7, %s526_s12), 7 }
  0x11   : > { %s213_s24 = sadd.s32 %s445_s22, %s444_s23  ;;  %s447_s29 = sshll.u32 %s643_s13, 3 }
  0x12   : > { %s446_s25 = sshll.u32 %s213_s24, 2  ;;  %s222_s30 = sadd.s32 %s447_s29, %s647_s12 }
  0x13   : > { %s215_s28 = scalar_lea.vmem %s628_s0, %s446_s25  ;;  %s448_s4 = sshll.u32 %s222_s30, 3 }
  0x14   : > { %v234_v3 = vld [vmem:[%s215_s28] sm:$0xf]  ;;  %s224_s7 = scalar_lea.vmem %s630_s2, %s448_s4  ;;  %s450_s8 = sshll.u32 %s222_s30, 1 }
  0x15   : > { %459 = vmatmul.mubr.msk.bf16.vlgmr.msra.gmra.mxu0 %vm236_vm2, %v234_v3  ;;  %s232_s11 = scalar_lea.vmem %s631_s3, %s450_s8 }
  0xd5   : > { %v278_v4 = vpop.f32.mrf.mxu0 }
  0xd6   : > { %284 = vst [vmem:[%s224_s7] sm:$0xff] %v278_v4  ;;  %v285_v5 = vrot.slane %v278_v4, 4  ;;  %v292_v6 = vmul.f32 %v278_v4, %v278_v4 }
  0xd7   : > { %v460_v7 = vpop.f32.mrf.mxu0 }
  0xd8   : > { %v286_v8 = vadd.f32 %v285_v5, %v278_v4  ;;  %v293_v9 = vrot.slane %v292_v6, 4 }
  0xd9   : > { %v281_v10 = vpop.f32.mrf.mxu0 }
  0xda   : > { %v287_v11 = vrot.slane %v286_v8, 2  ;;  %v294_v12 = vadd.f32 %v293_v9, %v292_v6 }
  0xdb   : > { %v461_v13 = vpop.f32.mrf.mxu0 }
  0xdc   : > { %v288_v14 = vadd.f32 %v287_v11, %v286_v8  ;;  %v295_v15 = vrot.slane %v294_v12, 2 }
  0xde   : > { %v289_v16 = vrot.slane %v288_v14, 1  ;;  %v296_v17 = vadd.f32 %v295_v15, %v294_v12 }
  0xe0   : > { %v290_v18 = vadd.f32 %v289_v16, %v288_v14  ;;  %v297_v19 = vrot.slane %v296_v17, 1 }
  0xe2   : > { %291 = vst [vmem:[%s232_s11] sm:$0x1] %v290_v18  ;;  %v298_v20 = vadd.f32 %v297_v19, %v296_v17 }
  0xe4   : > { %299 = vst [vmem:[%s232_s11 + $0x1] sm:$0x1] %v298_v20 }
  0xe5 PF: > { %s14_s16 = sadd.s32 1, %s542_s16   ;;  %s632_s12 = smov %s534_s14 }
  0xe6   : > { %p11_p8 = scmp.ge.s32.totalorder %s14_s16, 18   ;;  %s633_s13 = smov %s538_s15 }
  0xe7   : > { %s634_s14 = smov %s637_s17  ;;  %s635_s15 = smov %s641_s18 }
  0xe8   :  { %13 = sbr.rel (!%p11_p8) target bundleno = 3 (0x3), region = 70 }

// kernel: _lambda_.7
= control target key start
LH: loop header
LB: loop body
LE: loop exit
PB: predicated region body
PF: predicated region fallthrough
CT: control target
= control target key end

     0   :  { %s2250_s18 = smov 0   ;;  %s2252_s19 = smov 0   ;;  %s2658_s0 = inlined_call_operand.vmem [shape: bf16[2,10,1,10,128], index: 0, kind: input, shape index: {}, may-alias: {0,1,2}]   ;;  %s2659_s1 = inlined_call_operand.vmem [shape: bf16[2,10,1,10,128], index: 1, kind: input, shape index: {}, may-alias: {0,1,2}]   ;;  %s2660_s2 = inlined_call_operand.vmem [shape: bf16[2,10,1,10,128], index: 2, kind: input, shape index: {}, may-alias: {0,1,2}]   ;;  %s2661_s3 = inlined_call_operand.vmem [shape: bf16[3,3,128,128], index: 3, kind: input, shape index: {}]   ;;  %s2662_s4 = inlined_call_operand.vmem [shape: f32[2,8,8,128], index: 4, kind: output, shape index: {0}]   ;;  %s2663_s5 = inlined_call_operand.vmem [shape: f32[2,8,2,128], index: 5, kind: output, shape index: {1}]  }
   0x1   :  { %s2254_s20 = smov 0   ;;  %s2256_s21 = smov 0  }
   0x2   :  { %s2258_s22 = smov 0  }
   0x3 LB: > { %s25_s23 = sadd.s32 1, %s2208_s20  ;;  %s28_s24 = sadd.s32 1, %s2212_s21  ;;  %s2216_s22 = sphi %s2258_s22, %s16_s22   ;;  %s2212_s21 = sphi %s2256_s21, %s2667_s21   ;;  %s2208_s20 = sphi %s2254_s20, %s2666_s20   ;;  %s2204_s19 = sphi %s2252_s19, %s2665_s19   ;;  %s2200_s18 = sphi %s2250_s18, %s2664_s18  }
   0x4   : > { %p26_p0 = scmp.ge.s32.totalorder %s25_s23, 8  ;;  %p1577_p1 = scmp.ge.s32.totalorder %s2216_s22, 1 }
   0x5   : > { %p252_p2 = scmp.lt.s32.totalorder %s2216_s22, 17 }
   0x6   : > { %s2669_s23 = smov (%p26_p0, %s25_s23), 0  ;;  %s2671_s24 = smov (!%p26_p0, %s28_s24), %s2212_s21 }
   0x7   : > { %p253_p3 = pnand %p1577_p1, %p252_p2  ;;  %p30_p4 = scmp.ge.s32.totalorder %s2671_s24, 2 }
   0x8   : > { %p315_p5 = scmp.lt.s32.totalorder (!%p253_p3), %s2204_s19, 1  ;;  %p317_p6 = scmp.lt.s32.totalorder (!%p253_p3), %s2200_s18, 9 }
   0x9   : > { %s2673_s24 = smov (%p30_p4, %s2671_s24), 0  ;;  %256 = sbr.rel (%p253_p3) target bundleno = 385 (0x181), region = 36 }
   0xa   : > { %s324_s26 = sadd.s32 (!%p253_p3), 1, %s2200_s18  ;;  %p348_p9 = scmp.lt.s32.totalorder (!%p253_p3), %s2200_s18, 7 }
   0xb   : > { %p327_p7 = scmp.lt.s32.totalorder (!%p253_p3), %s324_s26, 9 }
   0xe   : > { %v2100_v0 = vld [vmem:[%s2661_s3 + $0x78] sm:$0xff]   ;;  %v2218_v1 = vmov 0.0   ;;  %v2102_v3 = vld [vmem:[%s2661_s3 + $0x70] sm:$0xff]   ;;  %vm2219_vm0 = vmmov 0   ;;  %s2675_s19 = smov (!%p315_p5, %s2204_s19), 1  ;;  %v2104_v5 = vld [vmem:[%s2661_s3 + $0x68] sm:$0xff]  }
   0xf   : > { %1877 = vmatprep.subr.bf16.mxu0 %v2218_v1  ;;  %1897 = vmatprep.subr.bf16.mxu1 %v2218_v1  ;;  %v2101_v2 = vld [vmem:[%s2661_s3 + $0x38] sm:$0xff]   ;;  %v2103_v4 = vld [vmem:[%s2661_s3 + $0x30] sm:$0xff]   ;;  %s318_s8 = scalar_select %p317_p6, %s2200_s18, 9  ;;  %v2105_v6 = vld [vmem:[%s2661_s3 + $0x28] sm:$0xff]  }
  0x10   : > { %1878 = vmatpush3.bf16.msra.mxu0 %v2100_v0  ;;  %1893 = vmatprep.mubr.msk.bf16.mxu0 %vm2219_vm0, %v2218_v1  ;;  %s2314_s11 = smul.u32 20, %s2675_s19  ;;  %v2106_v7 = vld [vmem:[%s2661_s3 + $0x60] sm:$0xff]   ;;  %v2108_v9 = vld [vmem:[%s2661_s3 + $0x58] sm:$0xff]   ;;  %v2110_v14 = vld [vmem:[%s2661_s3 + $0x50] sm:$0xff]   ;;  %s2677_s26 = smov (!%p327_p7, %s324_s26), 9 }
  0x11   : > { %1898 = vmatpush3.bf16.msra.mxu1 %v2101_v2  ;;  %1879 = vmatprep.subr.bf16.mxu0 %v2218_v1  ;;  %s1578_s14 = sshll.u32 %s318_s8, 1  ;;  %v2107_v8 = vld [vmem:[%s2661_s3 + $0x20] sm:$0xff]   ;;  %v2109_v10 = vld [vmem:[%s2661_s3 + $0x18] sm:$0xff]   ;;  %v2111_v15 = vld [vmem:[%s2661_s3 + $0x10] sm:$0xff]  }
  0x12   : > { %1899 = vmatprep.subr.bf16.mxu1 %v2218_v1  ;;  %1913 = vmatprep.mubr.msk.bf16.mxu1 %vm2219_vm0, %v2218_v1  ;;  %s321_s15 = sadd.s32 %s2314_s11, %s1578_s14  ;;  %v2112_v17 = vld [vmem:[%s2661_s3 + $0x48] sm:$0xff]   ;;  %v2114_v21 = vld [vmem:[%s2661_s3 + $0x40] sm:$0xff]   ;;  %v2117_v24 = vld [vmem:[%s2661_s3 + $0xb8] sm:$0xff]   ;;  %s1580_s14 = sshll.u32 %s2677_s26, 1 }
  0x13   : > { %s1579_s25 = sshll.u32 %s321_s15, 2  ;;  %v2113_v18 = vld [vmem:[%s2661_s3 + $0x8] sm:$0xff]   ;;  %v2115_v22 = vld [vmem:[%s2661_s3] sm:$0xff]   ;;  %v2118_v25 = vld [vmem:[%s2661_s3 + $0xf8] sm:$0xff]   ;;  %s331_s27 = sadd.s32 %s2314_s11, %s1580_s14 }
  0x14   : > { %1880 = vmatpush3.bf16.msra.mxu0 %v2102_v3  ;;  %s2333_s30 = scalar_lea.vmem %s2658_s0, %s1579_s25  ;;  %v2119_v26 = vld [vmem:[%s2661_s3 + $0xb0] sm:$0xff]   ;;  %v2121_v28 = vld [vmem:[%s2661_s3 + $0xa8] sm:$0xff]   ;;  %v2123_v30 = vld [vmem:[%s2661_s3 + $0xa0] sm:$0xff]   ;;  %s1581_s29 = sshll.u32 %s331_s27, 2 }
  0x15   : > { %1900 = vmatpush3.bf16.msra.mxu1 %v2103_v4  ;;  %1881 = vmatprep.subr.bf16.mxu0 %v2218_v1  ;;  %v363_v11 = vld [vmem:[%s2333_s30] sm:$0xf]  ;;  %v2345_v12 = vld [vmem:[%s2333_s30 + $0x4] sm:$0x1]  ;;  %v2120_v27 = vld [vmem:[%s2661_s3 + $0xf0] sm:$0xff]   ;;  %s2446_s12 = scalar_lea.vmem %s2659_s1, %s1581_s29 }
  0x16   : > { %1901 = vmatprep.subr.bf16.mxu1 %v2218_v1  ;;  %v1604_v13 = vcombine.low %v363_v11, %v2345_v12  ;;  %v2122_v29 = vld [vmem:[%s2661_s3 + $0xe8] sm:$0xff]   ;;  %v2124_v31 = vld [vmem:[%s2661_s3 + $0xe0] sm:$0xff]   ;;  %v2125_v32 = vld [vmem:[%s2661_s3 + $0x98] sm:$0xff]  }
  0x17   : > { %v2126_v33 = vld [vmem:[%s2661_s3 + $0xd8] sm:$0xff]   ;;  %v2127_v34 = vld [vmem:[%s2661_s3 + $0x90] sm:$0xff]   ;;  %v2129_v36 = vld [vmem:[%s2661_s3 + $0x88] sm:$0xff]  }
  0x18   : > { %1882 = vmatpush3.bf16.msra.mxu0 %v2104_v5  ;;  %v406_v16 = vshll.u32 %v1604_v13, 16  ;;  %v404_v19 = vshrl.u32 %v1604_v13, 16  ;;  %v2128_v35 = vld [vmem:[%s2661_s3 + $0xd0] sm:$0xff]   ;;  %v587_v37 = vld [vmem:[%s2333_s30] sm:$0xe]  ;;  %v2130_v38 = vld [vmem:[%s2661_s3 + $0xc8] sm:$0xff]  }
  0x19   : > { %1902 = vmatpush3.bf16.msra.mxu1 %v2105_v6  ;;  %1883 = vmatprep.subr.bf16.mxu0 %v2218_v1  ;;  %v1637_v39 = vcombine.low %v587_v37, %v2345_v12  ;;  %v2131_v40 = vld [vmem:[%s2661_s3 + $0x80] sm:$0xff]   ;;  %v2134_v43 = vld [vmem:[%s2661_s3 + $0x138] sm:$0xff]   ;;  %v2136_v46 = vld [vmem:[%s2661_s3 + $0x130] sm:$0xff]   ;;  %s335_s30 = sadd.s32 2, %s2200_s18  ;;  %s2681_s18 = smov (!%p348_p9, %s2200_s18), 7 }
  0x1a   : > { %1903 = vmatprep.subr.bf16.mxu1 %v2218_v1  ;;  %v408_v20 = vrot.slane %v406_v16, 1  ;;  %v2132_v41 = vld [vmem:[%s2661_s3 + $0xc0] sm:$0xff]   ;;  %v2135_v45 = vld [vmem:[%s2661_s3 + $0x178] sm:$0xff]   ;;  %v2137_v47 = vld [vmem:[%s2661_s3 + $0x170] sm:$0xff]   ;;  %p338_p8 = scmp.lt.s32.totalorder %s335_s30, 9 }
  0x1b   : > { %v608_v42 = vrot.slane %v1637_v39, 1  ;;  %v699_v44 = vld [vmem:[%s2446_s12] sm:$0xf]  ;;  %v2138_v48 = vld [vmem:[%s2661_s3 + $0x128] sm:$0xff]   ;;  %v807_v53 = vld [vmem:[%s2446_s12 + $0x4] sm:$0x1] }
  0x1c   : > { %1884 = vmatpush3.bf16.msra.mxu0 %v2106_v7  ;;  %v409_v23 = vor.u32 %v408_v20, %v404_v19  ;;  %v2139_v49 = vld [vmem:[%s2661_s3 + $0x168] sm:$0xff]   ;;  %v2140_v50 = vld [vmem:[%s2661_s3 + $0x120] sm:$0xff]   ;;  %v2142_v54 = vld [vmem:[%s2661_s3 + $0x118] sm:$0xff]   ;;  %s2679_s30 = smov (!%p338_p8, %s335_s30), 9 }
  0x1d   : > { %1904 = vmatpush3.bf16.msra.mxu1 %v2107_v8  ;;  %1885 = vmatprep.subr.bf16.mxu0 %v2218_v1  ;;  %v2141_v51 = vld [vmem:[%s2661_s3 + $0x160] sm:$0xff]   ;;  %v2143_v55 = vld [vmem:[%s2661_s3 + $0x158] sm:$0xff]   ;;  %v2144_v57 = vld [vmem:[%s2661_s3 + $0x110] sm:$0xff]   ;;  %s1582_s28 = sshll.u32 %s2679_s30, 1 }
  0x1e   : > { %1905 = vmatprep.subr.bf16.mxu1 %v2218_v1  ;;  %v806_v52 = vld [vmem:[%s2446_s12] sm:$0xf]  ;;  %v2145_v58 = vld [vmem:[%s2661_s3 + $0x150] sm:$0xff]   ;;  %v2146_v60 = vld [vmem:[%s2661_s3 + $0x108] sm:$0xff]   ;;  %s342_s7 = sadd.s32 %s2314_s11, %s1582_s28 }
  0x1f   : > { %v1686_v56 = vcombine.low %v806_v52, %v807_v53  ;;  %v2147_v61 = vld [vmem:[%s2661_s3 + $0x148] sm:$0xff]   ;;  %v927_v62 = vld [vmem:[%s2446_s12] sm:$0xe]  ;;  %v2151_v6 = vld [vmem:[%s2661_s3 + $0x1b8] sm:$0xff]   ;;  %s1583_s30 = sshll.u32 %s342_s7, 2 }
  0x20   : > { %1886 = vmatpush3.bf16.msra.mxu0 %v2108_v9  ;;  %v2148_v2 = vld [vmem:[%s2661_s3 + $0x100] sm:$0xff]   ;;  %v1711_v3 = vcombine.low %v927_v62, %v807_v53  ;;  %v2153_v8 = vld [vmem:[%s2661_s3 + $0x1f8] sm:$0xff]   ;;  %v2154_v9 = vld [vmem:[%s2661_s3 + $0x1b0] sm:$0xff]   ;;  %s2562_s16 = scalar_lea.vmem %s2660_s2, %s1583_s30 }
  0x21   : > { %1906 = vmatpush3.bf16.msra.mxu1 %v2109_v10  ;;  %1887 = vmatprep.subr.bf16.mxu0 %v2218_v1  ;;  %v833_v59 = vshll.u32 %v1686_v56, 16  ;;  %v831_v63 = vshrl.u32 %v1686_v56, 16  ;;  %v2149_v4 = vld [vmem:[%s2661_s3 + $0x140] sm:$0xff]   ;;  %v2155_v10 = vld [vmem:[%s2661_s3 + $0x1f0] sm:$0xff]   ;;  %v2157_v12 = vld [vmem:[%s2661_s3 + $0x1e8] sm:$0xff]  }
  0x22   : > { %1907 = vmatprep.subr.bf16.mxu1 %v2218_v1  ;;  %v948_v7 = vrot.slane %v1711_v3, 1  ;;  %v2158_v13 = vld [vmem:[%s2661_s3 + $0x1a0] sm:$0xff]   ;;  %v2161_v16 = vld [vmem:[%s2661_s3 + $0x1d8] sm:$0xff]   ;;  %v2162_v19 = vld [vmem:[%s2661_s3 + $0x190] sm:$0xff]  }
  0x23   : > { %v835_v0 = vrot.slane %v833_v59, 1  ;;  %v2175_v37 = vld [vmem:[%s2661_s3 + $0x208] sm:$0xff]  }
  0x24   : > { %1888 = vmatpush3.bf16.msra.mxu0 %v2110_v14  ;;  %v2159_v14 = vld [vmem:[%s2661_s3 + $0x1e0] sm:$0xff]  }
  0x25   : > { %1908 = vmatpush3.bf16.msra.mxu1 %v2111_v15  ;;  %1889 = vmatprep.subr.bf16.mxu0 %v2218_v1  ;;  %v836_v5 = vor.u32 %v835_v0, %v831_v63  ;;  %v2160_v15 = vld [vmem:[%s2661_s3 + $0x198] sm:$0xff]  }
  0x26   : > { %1909 = vmatprep.subr.bf16.mxu1 %v2218_v1 }
  0x28   : > { %1890 = vmatpush3.bf16.msra.mxu0 %v2112_v17  ;;  %v1146_v17 = vld [vmem:[%s2562_s16] sm:$0xf] }
  0x29   : > { %1910 = vmatpush3.bf16.msra.mxu1 %v2113_v18  ;;  %1891 = vmatprep.subr.bf16.mxu0 %v2218_v1  ;;  %v1147_v18 = vld [vmem:[%s2562_s16 + $0x4] sm:$0x1] }
  0x2a   : > { %1911 = vmatprep.subr.bf16.mxu1 %v2218_v1  ;;  %v1760_v20 = vcombine.low %v1146_v17, %v1147_v18 }
  0x2c   : > { %1892 = vmatpush3.bf16.msra.mxu0 %v2114_v21  ;;  %v2163_v21 = vld [vmem:[%s2661_s3 + $0x1d0] sm:$0xff]  }
  0x2d   : > { %1912 = vmatpush3.bf16.msra.mxu1 %v2115_v22  ;;  %1917 = vmatprep.subr.bf16.mxu0 %v2218_v1  ;;  %v2164_v22 = vld [vmem:[%s2661_s3 + $0x188] sm:$0xff]  }
  0x2e   : > { %1937 = vmatprep.subr.bf16.mxu1 %v2218_v1 }
  0x2f   : > { %1894 = vmatmul.mubr.bf16.vlgmr.msra.gmra.mxu0 %v409_v23  ;;  %v1173_v23 = vshll.u32 %v1760_v20, 16 }
  0x30   : > { %1914 = vmatmul.mubr.bf16.vlgmr.msra.gmra.mxu1 %v363_v11  ;;  %1918 = vmatpush3.bf16.msra.mxu0 %v2117_v24  ;;  %v2156_v11 = vld [vmem:[%s2661_s3 + $0x1a8] sm:$0xff]  }
  0x31   : > { %1938 = vmatpush3.bf16.msra.mxu1 %v2118_v25  ;;  %1919 = vmatprep.subr.bf16.mxu0 %v2218_v1  ;;  %v2165_v24 = vld [vmem:[%s2661_s3 + $0x1c8] sm:$0xff]   ;;  %v2166_v25 = vld [vmem:[%s2661_s3 + $0x180] sm:$0xff]  }
  0x32   : > { %1939 = vmatprep.subr.bf16.mxu1 %v2218_v1  ;;  %1933 = vmatprep.mubr.msk.bf16.mxu0 %vm2219_vm0, %v2218_v1 }
  0x33   : > { %1953 = vmatprep.mubr.msk.bf16.mxu1 %vm2219_vm0, %v2218_v1 }
  0x34   : > { %1920 = vmatpush3.bf16.msra.mxu0 %v2119_v26  ;;  %v1171_v26 = vshrl.u32 %v1760_v20, 16 }
  0x35   : > { %1940 = vmatpush3.bf16.msra.mxu1 %v2120_v27  ;;  %1921 = vmatprep.subr.bf16.mxu0 %v2218_v1  ;;  %v1175_v27 = vrot.slane %v1173_v23, 1 }
  0x36   : > { %1941 = vmatprep.subr.bf16.mxu1 %v2218_v1 }
  0x38   : > { %1922 = vmatpush3.bf16.msra.mxu0 %v2121_v28  ;;  %v2167_v28 = vld [vmem:[%s2661_s3 + $0x1c0] sm:$0xff]  }
  0x39   : > { %1942 = vmatpush3.bf16.msra.mxu1 %v2122_v29  ;;  %1923 = vmatprep.subr.bf16.mxu0 %v2218_v1  ;;  %v1039_v29 = vld [vmem:[%s2562_s16] sm:$0xf] }
  0x3a   : > { %1943 = vmatprep.subr.bf16.mxu1 %v2218_v1 }
  0x3c   : > { %1924 = vmatpush3.bf16.msra.mxu0 %v2123_v30  ;;  %v2168_v30 = vld [vmem:[%s2661_s3 + $0x238] sm:$0xff]  }
  0x3d   : > { %1944 = vmatpush3.bf16.msra.mxu1 %v2124_v31  ;;  %1925 = vmatprep.subr.bf16.mxu0 %v2218_v1  ;;  %v1176_v31 = vor.u32 %v1175_v27, %v1171_v26 }
  0x3e   : > { %1945 = vmatprep.subr.bf16.mxu1 %v2218_v1 }
  0x40   : > { %1926 = vmatpush3.bf16.msra.mxu0 %v2125_v32  ;;  %v2170_v32 = vld [vmem:[%s2661_s3 + $0x230] sm:$0xff]  }
  0x41   : > { %1946 = vmatpush3.bf16.msra.mxu1 %v2126_v33  ;;  %1927 = vmatprep.subr.bf16.mxu0 %v2218_v1  ;;  %v2171_v33 = vld [vmem:[%s2661_s3 + $0x228] sm:$0xff]  }
  0x42   : > { %1947 = vmatprep.subr.bf16.mxu1 %v2218_v1 }
  0x44   : > { %1928 = vmatpush3.bf16.msra.mxu0 %v2127_v34  ;;  %v2172_v34 = vld [vmem:[%s2661_s3 + $0x220] sm:$0xff]  }
  0x45   : > { %1948 = vmatpush3.bf16.msra.mxu1 %v2128_v35  ;;  %1929 = vmatprep.subr.bf16.mxu0 %v2218_v1  ;;  %v2173_v35 = vld [vmem:[%s2661_s3 + $0x218] sm:$0xff]  }
  0x46   : > { %1949 = vmatprep.subr.bf16.mxu1 %v2218_v1 }
  0x48   : > { %1930 = vmatpush3.bf16.msra.mxu0 %v2129_v36  ;;  %v2174_v36 = vld [vmem:[%s2661_s3 + $0x210] sm:$0xff]  }
  0x49   : > { %1950 = vmatpush3.bf16.msra.mxu1 %v2130_v38  ;;  %1931 = vmatprep.subr.bf16.mxu0 %v2218_v1  ;;  %v1267_v38 = vld [vmem:[%s2562_s16] sm:$0xe]  ;;  %s1584_s16 = sshll.u32 %s2675_s19, 3 }
  0x4a   : > { %1951 = vmatprep.subr.bf16.mxu1 %v2218_v1  ;;  %v1785_v39 = vcombine.low %v1267_v38, %v1147_v18  ;;  %s351_s14 = sadd.s32 %s1584_s16, %s2681_s18 }
  0x4b   : > { %s1585_s15 = sshll.u32 %s351_s14, 3  ;;  %s1587_s18 = sshll.u32 %s351_s14, 1 }
  0x4c   : > { %1932 = vmatpush3.bf16.msra.mxu0 %v2131_v40  ;;  %v2176_v40 = vld [vmem:[%s2661_s3 + $0x200] sm:$0xff]   ;;  %s353_s27 = scalar_lea.vmem %s2662_s4, %s1585_s15  ;;  %s361_s28 = scalar_lea.vmem %s2663_s5, %s1587_s18 }
  0x4d   : > { %1952 = vmatpush3.bf16.msra.mxu1 %v2132_v41  ;;  %1957 = vmatprep.subr.bf16.mxu0 %v2218_v1  ;;  %v1288_v41 = vrot.slane %v1785_v39, 1 }
  0x4e   : > { %1977 = vmatprep.subr.bf16.mxu1 %v2218_v1 }
  0x4f   : > { %1934 = vmatmul.mubr.bf16.vlgmr.msra.gmra.mxu0 %v608_v42 }
  0x50   : > { %1958 = vmatpush3.bf16.msra.mxu0 %v2134_v43  ;;  %1954 = vmatmul.mubr.bf16.vlgmr.msra.gmra.mxu1 %v699_v44 }
  0x51   : > { %1978 = vmatpush3.bf16.msra.mxu1 %v2135_v45  ;;  %1959 = vmatprep.subr.bf16.mxu0 %v2218_v1 }
  0x52   : > { %1979 = vmatprep.subr.bf16.mxu1 %v2218_v1  ;;  %1973 = vmatprep.mubr.msk.bf16.mxu0 %vm2219_vm0, %v2218_v1 }
  0x53   : > { %1993 = vmatprep.mubr.msk.bf16.mxu1 %vm2219_vm0, %v2218_v1 }
  0x54   : > { %1960 = vmatpush3.bf16.msra.mxu0 %v2136_v46 }
  0x55   : > { %1980 = vmatpush3.bf16.msra.mxu1 %v2137_v47  ;;  %1961 = vmatprep.subr.bf16.mxu0 %v2218_v1 }
  0x56   : > { %1981 = vmatprep.subr.bf16.mxu1 %v2218_v1 }
  0x58   : > { %1962 = vmatpush3.bf16.msra.mxu0 %v2138_v48 }
  0x59   : > { %1982 = vmatpush3.bf16.msra.mxu1 %v2139_v49  ;;  %1963 = vmatprep.subr.bf16.mxu0 %v2218_v1 }
  0x5a   : > { %1983 = vmatprep.subr.bf16.mxu1 %v2218_v1 }
  0x5c   : > { %1964 = vmatpush3.bf16.msra.mxu0 %v2140_v50 }
  0x5d   : > { %1984 = vmatpush3.bf16.msra.mxu1 %v2141_v51  ;;  %1965 = vmatprep.subr.bf16.mxu0 %v2218_v1 }
  0x5e   : > { %1985 = vmatprep.subr.bf16.mxu1 %v2218_v1 }
  0x60   : > { %1966 = vmatpush3.bf16.msra.mxu0 %v2142_v54 }
  0x61   : > { %1986 = vmatpush3.bf16.msra.mxu1 %v2143_v55  ;;  %1967 = vmatprep.subr.bf16.mxu0 %v2218_v1 }
  0x62   : > { %1987 = vmatprep.subr.bf16.mxu1 %v2218_v1 }
  0x64   : > { %1968 = vmatpush3.bf16.msra.mxu0 %v2144_v57 }
  0x65   : > { %1988 = vmatpush3.bf16.msra.mxu1 %v2145_v58  ;;  %1969 = vmatprep.subr.bf16.mxu0 %v2218_v1 }
  0x66   : > { %1989 = vmatprep.subr.bf16.mxu1 %v2218_v1 }
  0x68   : > { %1970 = vmatpush3.bf16.msra.mxu0 %v2146_v60 }
  0x69   : > { %1990 = vmatpush3.bf16.msra.mxu1 %v2147_v61  ;;  %1971 = vmatprep.subr.bf16.mxu0 %v2218_v1 }
  0x6a   : > { %1991 = vmatprep.subr.bf16.mxu1 %v2218_v1 }
  0x6c   : > { %1972 = vmatpush3.bf16.msra.mxu0 %v2148_v2 }
  0x6d   : > { %1992 = vmatpush3.bf16.msra.mxu1 %v2149_v4  ;;  %1997 = vmatprep.subr.bf16.mxu0 %v2218_v1 }
  0x6e   : > { %2017 = vmatprep.subr.bf16.mxu1 %v2218_v1 }
  0x6f   : > { %1974 = vmatmul.mubr.bf16.vlgmr.msra.gmra.mxu0 %v836_v5 }
  0x70   : > { %1998 = vmatpush3.bf16.msra.mxu0 %v2151_v6  ;;  %1994 = vmatmul.mubr.bf16.vlgmr.msra.gmra.mxu1 %v948_v7 }
  0x71   : > { %2018 = vmatpush3.bf16.msra.mxu1 %v2153_v8  ;;  %1999 = vmatprep.subr.bf16.mxu0 %v2218_v1 }
  0x72   : > { %2019 = vmatprep.subr.bf16.mxu1 %v2218_v1  ;;  %2013 = vmatprep.mubr.msk.bf16.mxu0 %vm2219_vm0, %v2218_v1 }
  0x73   : > { %2033 = vmatprep.mubr.msk.bf16.mxu1 %vm2219_vm0, %v2218_v1 }
  0x74   : > { %2000 = vmatpush3.bf16.msra.mxu0 %v2154_v9 }
  0x75   : > { %2020 = vmatpush3.bf16.msra.mxu1 %v2155_v10  ;;  %2001 = vmatprep.subr.bf16.mxu0 %v2218_v1 }
  0x76   : > { %2021 = vmatprep.subr.bf16.mxu1 %v2218_v1 }
  0x78   : > { %2002 = vmatpush3.bf16.msra.mxu0 %v2156_v11 }
  0x79   : > { %2022 = vmatpush3.bf16.msra.mxu1 %v2157_v12  ;;  %2003 = vmatprep.subr.bf16.mxu0 %v2218_v1 }
  0x7a   : > { %2023 = vmatprep.subr.bf16.mxu1 %v2218_v1 }
  0x7c   : > { %2004 = vmatpush3.bf16.msra.mxu0 %v2158_v13 }
  0x7d   : > { %2024 = vmatpush3.bf16.msra.mxu1 %v2159_v14  ;;  %2005 = vmatprep.subr.bf16.mxu0 %v2218_v1 }
  0x7e   : > { %2025 = vmatprep.subr.bf16.mxu1 %v2218_v1 }
  0x80   : > { %2006 = vmatpush3.bf16.msra.mxu0 %v2160_v15 }
  0x81   : > { %2026 = vmatpush3.bf16.msra.mxu1 %v2161_v16  ;;  %2007 = vmatprep.subr.bf16.mxu0 %v2218_v1 }
  0x82   : > { %2027 = vmatprep.subr.bf16.mxu1 %v2218_v1 }
  0x84   : > { %2008 = vmatpush3.bf16.msra.mxu0 %v2162_v19 }
  0x85   : > { %2028 = vmatpush3.bf16.msra.mxu1 %v2163_v21  ;;  %2009 = vmatprep.subr.bf16.mxu0 %v2218_v1 }
  0x86   : > { %2029 = vmatprep.subr.bf16.mxu1 %v2218_v1 }
  0x88   : > { %2010 = vmatpush3.bf16.msra.mxu0 %v2164_v22 }
  0x89   : > { %2030 = vmatpush3.bf16.msra.mxu1 %v2165_v24  ;;  %2011 = vmatprep.subr.bf16.mxu0 %v2218_v1 }
  0x8a   : > { %2031 = vmatprep.subr.bf16.mxu1 %v2218_v1 }
  0x8c   : > { %2012 = vmatpush3.bf16.msra.mxu0 %v2166_v25 }
  0x8d   : > { %2032 = vmatpush3.bf16.msra.mxu1 %v2167_v28  ;;  %2037 = vmatprep.subr.bf16.mxu0 %v2218_v1 }
  0x8f   : > { %2014 = vmatmul.mubr.bf16.vlgmr.msra.gmra.mxu0 %v1039_v29 }
  0x90   : > { %2038 = vmatpush3.bf16.msra.mxu0 %v2168_v30  ;;  %2034 = vmatmul.mubr.bf16.vlgmr.msra.gmra.mxu1 %v1176_v31 }
  0x91   : > { %2039 = vmatprep.subr.bf16.mxu0 %v2218_v1  ;;  %2053 = vmatprep.mubr.msk.bf16.mxu0 %vm2219_vm0, %v2218_v1 }
  0x94   : > { %2040 = vmatpush3.bf16.msra.mxu0 %v2170_v32 }
  0x95   : > { %2041 = vmatprep.subr.bf16.mxu0 %v2218_v1 }
  0x98   : > { %2042 = vmatpush3.bf16.msra.mxu0 %v2171_v33 }
  0x99   : > { %2043 = vmatprep.subr.bf16.mxu0 %v2218_v1 }
  0x9c   : > { %2044 = vmatpush3.bf16.msra.mxu0 %v2172_v34 }
  0x9d   : > { %2045 = vmatprep.subr.bf16.mxu0 %v2218_v1 }
  0xa0   : > { %2046 = vmatpush3.bf16.msra.mxu0 %v2173_v35 }
  0xa1   : > { %2047 = vmatprep.subr.bf16.mxu0 %v2218_v1 }
  0xa4   : > { %2048 = vmatpush3.bf16.msra.mxu0 %v2174_v36 }
  0xa5   : > { %2049 = vmatprep.subr.bf16.mxu0 %v2218_v1 }
  0xa8   : > { %2050 = vmatpush3.bf16.msra.mxu0 %v2175_v37 }
  0xa9   : > { %2051 = vmatprep.subr.bf16.mxu0 %v2218_v1 }
  0xac   : > { %2052 = vmatpush3.bf16.msra.mxu0 %v2176_v40 }
  0xaf   : > { %2054 = vmatmul.mubr.bf16.vlgmr.msra.gmra.mxu0 %v1288_v41 }
  0xef   : > { %v493_v42 = vpop.f32.mrf.mxu0 }
  0xf0   : > { %v581_v43 = vpop.f32.mrf.mxu1 }
  0xf1   : > { %v582_v44 = vadd.f32 %v581_v43, %v493_v42  ;;  %v1895_v45 = vpop.f32.mrf.mxu0 }
  0xf2   : > { %v1915_v46 = vpop.f32.mrf.mxu1 }
  0xf3   : > { %v496_v47 = vpop.f32.mrf.mxu0 }
  0xf4   : > { %v584_v48 = vpop.f32.mrf.mxu1 }
  0xf5   : > { %v1896_v49 = vpop.f32.mrf.mxu0 }
  0xf6   : > { %v1916_v50 = vpop.f32.mrf.mxu1 }
 0x10f   : > { %v692_v51 = vpop.f32.mrf.mxu0 }
 0x110   : > { %v698_v52 = vadd.f32 %v692_v51, %v582_v44  ;;  %v799_v53 = vpop.f32.mrf.mxu1 }
 0x111   : > { %v1935_v54 = vpop.f32.mrf.mxu0 }
 0x112   : > { %v805_v55 = vadd.f32 %v799_v53, %v698_v52  ;;  %v1955_v56 = vpop.f32.mrf.mxu1 }
 0x113   : > { %v695_v57 = vpop.f32.mrf.mxu0 }
 0x114   : > { %v802_v1 = vpop.f32.mrf.mxu1 }
 0x115   : > { %v1936_v58 = vpop.f32.mrf.mxu0 }
 0x116   : > { %v1956_v59 = vpop.f32.mrf.mxu1 }
 0x12f   : > { %v920_v60 = vpop.f32.mrf.mxu0 }
 0x130   : > { %v1032_v61 = vpop.f32.mrf.mxu1  ;;  %v926_v13 = vadd.f32 %v920_v60, %v805_v55 }
 0x131   : > { %v1975_v62 = vpop.f32.mrf.mxu0 }
 0x132   : > { %v1995_v63 = vpop.f32.mrf.mxu1  ;;  %v1038_v14 = vadd.f32 %v1032_v61, %v926_v13 }
 0x133   : > { %v923_v0 = vpop.f32.mrf.mxu0 }
 0x134   : > { %v1035_v2 = vpop.f32.mrf.mxu1 }
 0x135   : > { %v1976_v3 = vpop.f32.mrf.mxu0 }
 0x136   : > { %v1996_v4 = vpop.f32.mrf.mxu1 }
 0x14f   : > { %v1139_v5 = vpop.f32.mrf.mxu0 }
 0x150   : > { %v1260_v6 = vpop.f32.mrf.mxu1  ;;  %v1145_v15 = vadd.f32 %v1139_v5, %v1038_v14 }
 0x151   : > { %v2015_v7 = vpop.f32.mrf.mxu0 }
 0x152   : > { %v2035_v8 = vpop.f32.mrf.mxu1  ;;  %v1266_v16 = vadd.f32 %v1260_v6, %v1145_v15 }
 0x153   : > { %v1142_v9 = vpop.f32.mrf.mxu0 }
 0x154   : > { %v1263_v10 = vpop.f32.mrf.mxu1 }
 0x155   : > { %v2016_v11 = vpop.f32.mrf.mxu0 }
 0x156   : > { %v2036_v12 = vpop.f32.mrf.mxu1 }
 0x16f   : > { %v1372_v17 = vpop.f32.mrf.mxu0 }
 0x170   : > { %v1378_v18 = vadd.f32 %v1372_v17, %v1266_v16 }
 0x171   : > { %v2055_v19 = vpop.f32.mrf.mxu0 }
 0x172   : > { %1379 = vst [vmem:[%s353_s27] sm:$0xff] %v1378_v18  ;;  %v1380_v20 = vrot.slane %v1378_v18, 4  ;;  %v1387_v21 = vmul.f32 %v1378_v18, %v1378_v18 }
 0x173   : > { %v1375_v22 = vpop.f32.mrf.mxu0 }
 0x174   : > { %v1381_v23 = vadd.f32 %v1380_v20, %v1378_v18  ;;  %v1388_v24 = vrot.slane %v1387_v21, 4 }
 0x175   : > { %v2056_v25 = vpop.f32.mrf.mxu0 }
 0x176   : > { %v1382_v26 = vrot.slane %v1381_v23, 2  ;;  %v1389_v27 = vadd.f32 %v1388_v24, %v1387_v21 }
 0x178   : > { %v1383_v28 = vadd.f32 %v1382_v26, %v1381_v23  ;;  %v1390_v29 = vrot.slane %v1389_v27, 2 }
 0x17a   : > { %v1384_v30 = vrot.slane %v1383_v28, 1  ;;  %v1391_v31 = vadd.f32 %v1390_v29, %v1389_v27 }
 0x17c   : > { %v1385_v32 = vadd.f32 %v1384_v30, %v1383_v28  ;;  %v1392_v33 = vrot.slane %v1391_v31, 1 }
 0x17e   : > { %1386 = vst [vmem:[%s361_s28] sm:$0x1] %v1385_v32  ;;  %v1393_v34 = vadd.f32 %v1392_v33, %v1391_v31 }
 0x180   : > { %1394 = vst [vmem:[%s361_s28 + $0x1] sm:$0x1] %v1393_v34 }
 0x181 PF: > { %s16_s22 = sadd.s32 1, %s2216_s22   ;;  %s2664_s18 = smov %s2208_s20 }
 0x182   : > { %p13_p10 = scmp.ge.s32.totalorder %s16_s22, 18   ;;  %s2665_s19 = smov %s2212_s21 }
 0x183   : > { %s2666_s20 = smov %s2669_s23  ;;  %s2667_s21 = smov %s2673_s24 }
 0x184   :  { %15 = sbr.rel (!%p13_p10) target bundleno = 3 (0x3), region = 92 }

// kernel: _lambda_.9
= control target key start
LH: loop header
LB: loop body
LE: loop exit
PB: predicated region body
PF: predicated region fallthrough
CT: control target
= control target key end

     0   :  { %s466_s0 = inlined_call_operand.vmem [shape: f32[128,128], index: 0, kind: input, shape index: {}]   ;;  %s467_s1 = inlined_call_operand.vmem [shape: f32[1,128], index: 1, kind: input, shape index: {}]   ;;  %s468_s2 = inlined_call_operand.vmem [shape: f32[1,128], index: 2, kind: input, shape index: {}]   ;;  %s469_s3 = inlined_call_operand.vmem [shape: f32[128,128], index: 3, kind: input, shape index: {}]   ;;  %s470_s4 = inlined_call_operand.vmem [shape: f32[1,128], index: 4, kind: input, shape index: {}]   ;;  %s471_s5 = inlined_call_operand.vmem [shape: f32[1,128], index: 5, kind: input, shape index: {}]   ;;  %s472_s6 = inlined_call_operand.vmem [shape: f32[128,128], index: 6, kind: output, shape index: {}]  }
   0x1   :  { %v23_v0 = vld [vmem:[%s466_s0] sm:$0xff]  ;;  %v24_v8 = vld [vmem:[%s466_s0 + $0x8] sm:$0xff]  ;;  %v25_v10 = vld [vmem:[%s466_s0 + $0x10] sm:$0xff] }
   0x2   :  { %v244_v1 = vld [vmem:[%s467_s1] ss:$0 sm:$0xff]  ;;  %v86_v9 = vld [vmem:[%s469_s3 + $0x8] sm:$0xff]  ;;  %v87_v15 = vld [vmem:[%s469_s3 + $0x10] sm:$0xff] }
   0x3   :  { %v249_v2 = vld [vmem:[%s468_s2] ss:$0 sm:$0xff]  ;;  %v46_v3 = vmul.f32 %v244_v1, %v23_v0  ;;  %v47_v12 = vmul.f32 %v244_v1, %v24_v8  ;;  %v48_v14 = vmul.f32 %v244_v1, %v25_v10  ;;  %v26_v16 = vld [vmem:[%s466_s0 + $0x18] sm:$0xff]  ;;  %v28_v24 = vld [vmem:[%s466_s0 + $0x28] sm:$0xff] }
   0x4   :  { %v85_v4 = vld [vmem:[%s469_s3] sm:$0xff]  ;;  %v88_v17 = vld [vmem:[%s469_s3 + $0x18] sm:$0xff]  ;;  %v49_v20 = vmul.f32 %v244_v1, %v26_v16  ;;  %v90_v29 = vld [vmem:[%s469_s3 + $0x28] sm:$0xff]  ;;  %v51_v38 = vmul.f32 %v244_v1, %v28_v24 }
   0x5   :  { %v258_v5 = vld [vmem:[%s470_s4] ss:$0 sm:$0xff]  ;;  %v69_v11 = vadd.f32 %v249_v2, %v46_v3  ;;  %v70_v25 = vadd.f32 %v249_v2, %v47_v12  ;;  %v71_v27 = vadd.f32 %v249_v2, %v48_v14  ;;  %v29_v34 = vld [vmem:[%s466_s0 + $0x30] sm:$0xff]  ;;  %v30_v44 = vld [vmem:[%s466_s0 + $0x38] sm:$0xff] }
   0x6   :  { %v263_v6 = vld [vmem:[%s471_s5] ss:$0 sm:$0xff]  ;;  %v108_v7 = vmul.f32 %v258_v5, %v85_v4  ;;  %v109_v13 = vmul.f32 %v258_v5, %v86_v9  ;;  %v110_v19 = vmul.f32 %v258_v5, %v87_v15  ;;  %v111_v21 = vmul.f32 %v258_v5, %v88_v17  ;;  %v91_v39 = vld [vmem:[%s469_s3 + $0x30] sm:$0xff]  ;;  %v92_v45 = vld [vmem:[%s469_s3 + $0x38] sm:$0xff] }
   0x7   :  { %v27_v22 = vld [vmem:[%s466_s0 + $0x20] sm:$0xff]  ;;  %v72_v32 = vadd.f32 %v249_v2, %v49_v20  ;;  %v113_v43 = vmul.f32 %v258_v5, %v90_v29  ;;  %v74_v48 = vadd.f32 %v249_v2, %v51_v38  ;;  %v52_v49 = vmul.f32 %v244_v1, %v29_v34  ;;  %v32_v56 = vld [vmem:[%s466_s0 + $0x48] sm:$0xff]  ;;  %v33_v4 = vld [vmem:[%s466_s0 + $0x50] sm:$0xff] }
   0x8   :  { %v131_v18 = vadd.f32 %v263_v6, %v108_v7  ;;  %v89_v23 = vld [vmem:[%s469_s3 + $0x20] sm:$0xff]  ;;  %v132_v26 = vadd.f32 %v263_v6, %v109_v13  ;;  %v50_v28 = vmul.f32 %v244_v1, %v27_v22  ;;  %v133_v31 = vadd.f32 %v263_v6, %v110_v19  ;;  %v94_v3 = vld [vmem:[%s469_s3 + $0x48] sm:$0xff]  ;;  %v34_v12 = vld [vmem:[%s466_s0 + $0x58] sm:$0xff] }
   0x9   :  { %v134_v33 = vadd.f32 %v263_v6, %v111_v21  ;;  %v112_v37 = vmul.f32 %v258_v5, %v89_v23  ;;  %v31_v50 = vld [vmem:[%s466_s0 + $0x40] sm:$0xff]  ;;  %v136_v54 = vadd.f32 %v263_v6, %v113_v43  ;;  %v114_v55 = vmul.f32 %v258_v5, %v91_v39  ;;  %v96_v17 = vld [vmem:[%s469_s3 + $0x58] sm:$0xff]  ;;  %v37_v34 = vld [vmem:[%s466_s0 + $0x70] sm:$0xff] }
   0xa   :  { %v147_v30 = vadd.f32 %v131_v18, %v69_v11  ;;  %v148_v35 = vadd.f32 %v132_v26, %v70_v25  ;;  %v73_v36 = vadd.f32 %v249_v2, %v50_v28  ;;  %v149_v41 = vadd.f32 %v133_v31, %v71_v27  ;;  %v93_v51 = vld [vmem:[%s469_s3 + $0x40] sm:$0xff]  ;;  %v95_v11 = vld [vmem:[%s469_s3 + $0x50] sm:$0xff]  ;;  %v36_v28 = vld [vmem:[%s466_s0 + $0x68] sm:$0xff] }
   0xb   :  { %v150_v42 = vadd.f32 %v134_v33, %v72_v32  ;;  %v135_v47 = vadd.f32 %v263_v6, %v112_v37  ;;  %v75_v58 = vadd.f32 %v249_v2, %v52_v49  ;;  %v53_v59 = vmul.f32 %v244_v1, %v30_v44  ;;  %v35_v22 = vld [vmem:[%s466_s0 + $0x60] sm:$0xff]  ;;  %v98_v33 = vld [vmem:[%s469_s3 + $0x68] sm:$0xff]  ;;  %v99_v43 = vld [vmem:[%s469_s3 + $0x70] sm:$0xff] }
   0xc   :  { %v163_v40 = vmax.f32 %v147_v30, 0.0  ;;  %v164_v46 = vmax.f32 %v148_v35, 0.0  ;;  %v165_v52 = vmax.f32 %v149_v41, 0.0  ;;  %v115_v60 = vmul.f32 %v258_v5, %v92_v45  ;;  %v97_v27 = vld [vmem:[%s469_s3 + $0x60] sm:$0xff]  ;;  %v100_v49 = vld [vmem:[%s469_s3 + $0x78] sm:$0xff] }
   0xd   :  { %v166_v53 = vmax.f32 %v150_v42, 0.0  ;;  %v151_v57 = vadd.f32 %v135_v47, %v73_v36  ;;  %v152_v61 = vadd.f32 %v136_v54, %v74_v48  ;;  %v137_v62 = vadd.f32 %v263_v6, %v114_v55  ;;  %v38_v48 = vld [vmem:[%s466_s0 + $0x78] sm:$0xff] }
   0xe   :  { %179 = vst [vmem:[%s472_s6] sm:$0xff] %v163_v40  ;;  %180 = vst [vmem:[%s472_s6 + $0x8] sm:$0xff] %v164_v46  ;;  %v54_v63 = vmul.f32 %v244_v1, %v31_v50  ;;  %v116_v0 = vmul.f32 %v258_v5, %v93_v51  ;;  %v76_v8 = vadd.f32 %v249_v2, %v53_v59 }
   0xf   :  { %181 = vst [vmem:[%s472_s6 + $0x10] sm:$0xff] %v165_v52  ;;  %182 = vst [vmem:[%s472_s6 + $0x18] sm:$0xff] %v166_v53  ;;  %v167_v7 = vmax.f32 %v151_v57, 0.0  ;;  %v138_v9 = vadd.f32 %v263_v6, %v115_v60  ;;  %v55_v10 = vmul.f32 %v244_v1, %v32_v56  ;;  %v168_v13 = vmax.f32 %v152_v61, 0.0 }
  0x10   :  { %v153_v14 = vadd.f32 %v137_v62, %v75_v58  ;;  %v77_v15 = vadd.f32 %v249_v2, %v54_v63  ;;  %v139_v16 = vadd.f32 %v263_v6, %v116_v0  ;;  %v117_v20 = vmul.f32 %v258_v5, %v94_v3 }
  0x11   :  { %183 = vst [vmem:[%s472_s6 + $0x20] sm:$0xff] %v167_v7  ;;  %v154_v18 = vadd.f32 %v138_v9, %v76_v8  ;;  %v78_v19 = vadd.f32 %v249_v2, %v55_v10  ;;  %v56_v21 = vmul.f32 %v244_v1, %v33_v4  ;;  %184 = vst [vmem:[%s472_s6 + $0x28] sm:$0xff] %v168_v13 }
  0x12   :  { %v169_v23 = vmax.f32 %v153_v14, 0.0  ;;  %v155_v24 = vadd.f32 %v139_v16, %v77_v15  ;;  %v118_v25 = vmul.f32 %v258_v5, %v95_v11  ;;  %v57_v26 = vmul.f32 %v244_v1, %v34_v12 }
  0x13   :  { %v170_v29 = vmax.f32 %v154_v18, 0.0  ;;  %v140_v30 = vadd.f32 %v263_v6, %v117_v20  ;;  %v79_v31 = vadd.f32 %v249_v2, %v56_v21  ;;  %v119_v32 = vmul.f32 %v258_v5, %v96_v17 }
  0x14   :  { %185 = vst [vmem:[%s472_s6 + $0x30] sm:$0xff] %v169_v23  ;;  %v171_v35 = vmax.f32 %v155_v24, 0.0  ;;  %v141_v36 = vadd.f32 %v263_v6, %v118_v25  ;;  %v80_v37 = vadd.f32 %v249_v2, %v57_v26  ;;  %v58_v38 = vmul.f32 %v244_v1, %v35_v22 }
  0x15   :  { %186 = vst [vmem:[%s472_s6 + $0x38] sm:$0xff] %v170_v29  ;;  %v156_v39 = vadd.f32 %v140_v30, %v78_v19  ;;  %v142_v40 = vadd.f32 %v263_v6, %v119_v32  ;;  %v120_v41 = vmul.f32 %v258_v5, %v97_v27  ;;  %v59_v42 = vmul.f32 %v244_v1, %v36_v28 }
  0x16   :  { %187 = vst [vmem:[%s472_s6 + $0x40] sm:$0xff] %v171_v35  ;;  %v157_v44 = vadd.f32 %v141_v36, %v79_v31  ;;  %v81_v45 = vadd.f32 %v249_v2, %v58_v38  ;;  %v121_v46 = vmul.f32 %v258_v5, %v98_v33  ;;  %v60_v47 = vmul.f32 %v244_v1, %v37_v34 }
  0x17   :  { %v172_v50 = vmax.f32 %v156_v39, 0.0  ;;  %v158_v51 = vadd.f32 %v142_v40, %v80_v37  ;;  %v143_v52 = vadd.f32 %v263_v6, %v120_v41  ;;  %v82_v53 = vadd.f32 %v249_v2, %v59_v42 }
  0x18   :  { %v173_v54 = vmax.f32 %v157_v44, 0.0  ;;  %v144_v55 = vadd.f32 %v263_v6, %v121_v46  ;;  %v83_v56 = vadd.f32 %v249_v2, %v60_v47  ;;  %v122_v57 = vmul.f32 %v258_v5, %v99_v43 }
  0x19   :  { %188 = vst [vmem:[%s472_s6 + $0x48] sm:$0xff] %v172_v50  ;;  %v174_v58 = vmax.f32 %v158_v51, 0.0  ;;  %v159_v59 = vadd.f32 %v143_v52, %v81_v45  ;;  %v61_v60 = vmul.f32 %v244_v1, %v38_v48  ;;  %v123_v61 = vmul.f32 %v258_v5, %v100_v49 }
  0x1a   :  { %189 = vst [vmem:[%s472_s6 + $0x50] sm:$0xff] %v173_v54  ;;  %v160_v62 = vadd.f32 %v144_v55, %v82_v53  ;;  %v145_v63 = vadd.f32 %v263_v6, %v122_v57 }
  0x1b   :  { %190 = vst [vmem:[%s472_s6 + $0x58] sm:$0xff] %v174_v58  ;;  %v175_v0 = vmax.f32 %v159_v59, 0.0  ;;  %v84_v3 = vadd.f32 %v249_v2, %v61_v60  ;;  %v146_v4 = vadd.f32 %v263_v6, %v123_v61 }
  0x1c   :  { %v176_v7 = vmax.f32 %v160_v62, 0.0  ;;  %v161_v1 = vadd.f32 %v145_v63, %v83_v56 }
  0x1d   :  { %191 = vst [vmem:[%s472_s6 + $0x60] sm:$0xff] %v175_v0  ;;  %v162_v5 = vadd.f32 %v146_v4, %v84_v3 }
  0x1e   :  { %192 = vst [vmem:[%s472_s6 + $0x68] sm:$0xff] %v176_v7  ;;  %v177_v8 = vmax.f32 %v161_v1, 0.0 }
  0x1f   :  { %v178_v9 = vmax.f32 %v162_v5, 0.0 }
  0x20   :  { %193 = vst [vmem:[%s472_s6 + $0x70] sm:$0xff] %v177_v8 }
  0x21   :  { %194 = vst [vmem:[%s472_s6 + $0x78] sm:$0xff] %v178_v9 }

</bundles_post_ra>
